<compile_context>
chip_gen: v6e
topology: v6e:2x2x1
jax: 0.10.0
libtpu: 0.0.40
codegen_flags: <defaults>
</compile_context>

<pallas_src>
import functools

import jax
import jax.numpy as jnp
from jax.experimental import pallas as pl
from jax.experimental.pallas import tpu as pltpu

EPS = 1e-5


def _bn_relu_kernel(x_ref, gb_ref, o_ref, *, inv_s):
    # x_ref: (TC, S) tile — channels on sublanes, flattened spatial on lanes.
    # gb_ref: (TC, 2) — column 0 = gamma, column 1 = beta.
    x = x_ref[...].astype(jnp.float32)

    gb = gb_ref[...]
    gamma = gb[:, 0:1]                                  # (TC, 1)
    beta = gb[:, 1:2]                                   # (TC, 1)

    # Two-pass statistics over the lane (spatial) axis.
    mean = jnp.sum(x, axis=1, keepdims=True) * inv_s    # (TC, 1)
    centered = x - mean
    var = jnp.sum(centered * centered, axis=1, keepdims=True) * inv_s

    # y = (x - mean) * gamma * rsqrt(var + eps) + beta, then ReLU.
    a = gamma * jax.lax.rsqrt(var + EPS)                # (TC, 1)
    o_ref[...] = jnp.maximum(centered * a + beta, 0.0).astype(o_ref.dtype)


def batchnorm_relu(x_nchw, gamma, beta, *, c_tile=232):
    """Training-mode BatchNorm2d (biased batch var) + ReLU.

    x_nchw: (N, C, H, W) float32; gamma/beta: (C,) float32.
    """
    n, c, h, w = x_nchw.shape
    s = n * h * w
    if c % c_tile != 0 or c_tile % 8 != 0:
        c_tile = c                                      # fall back: single step

    # (N, C, H, W) -> (C, N*H*W).  For N == 1 this is a pure, zero-copy reshape.
    if n == 1:
        x_cs = x_nchw.reshape(c, s)
    else:
        # TODO(synk): for N > 1 use a 3-D (N, c_tile, H*W) BlockSpec reducing
        # over axes (0, 2) instead of paying an HBM transpose here.
        x_cs = jnp.transpose(x_nchw, (1, 0, 2, 3)).reshape(c, s)

    # Pack gamma/beta into one (C, 2) array -> a single small DMA per step.
    gb = jnp.stack(
        [gamma.astype(jnp.float32), beta.astype(jnp.float32)], axis=1
    )                                                   # (C, 2)

    grid = (c // c_tile,)
    kernel = functools.partial(_bn_relu_kernel, inv_s=1.0 / float(s))

    cost = pl.CostEstimate(
        flops=7 * c * s,
        transcendentals=c,
        bytes_accessed=2 * c * s * 4 + 2 * c * 4,
    )

    out_cs = pl.pallas_call(
        kernel,
        out_shape=jax.ShapeDtypeStruct((c, s), x_cs.dtype),
        grid_spec=pltpu.PrefetchScalarGridSpec(
            num_scalar_prefetch=0,
            grid=grid,
            in_specs=[
                pl.BlockSpec((c_tile, s), lambda i: (i, 0)),
                pl.BlockSpec((c_tile, 2), lambda i: (i, 0)),
            ],
            out_specs=pl.BlockSpec((c_tile, s), lambda i: (i, 0)),
        ),
        compiler_params=pltpu.CompilerParams(
            dimension_semantics=("parallel",)),
        cost_estimate=cost,
        input_output_aliases={0: 0},   # reuse the activation buffer for output
    )(x_cs, gb)

    # (C, N*H*W) -> (N, C, H, W).  Zero-copy reshape for N == 1.
    if n == 1:
        return out_cs.reshape(n, c, h, w)
    return jnp.transpose(out_cs.reshape(c, n, h, w), (1, 0, 2, 3))


if __name__ == "__main__":
    N, C, H, W = 1, 928, 14, 14  # matches BatchNorm2d(928) and x288's shape
    key = jax.random.PRNGKey(0)
    kx, kg, kb = jax.random.split(key, 3)
    x = jax.random.normal(kx, (N, C, H, W), dtype=jnp.float32)
    # PyTorch defaults are gamma=1, beta=0; random values exercise the full
    # affine path deterministically.
    gamma = jax.random.normal(kg, (C,), dtype=jnp.float32) * 0.1 + 1.0
    beta = jax.random.normal(kb, (C,), dtype=jnp.float32) * 0.1

    fn = jax.jit(batchnorm_relu)
    out = fn(x, gamma, beta)
    jax.block_until_ready(out)

    # Reference: training-mode batchnorm (biased var) + affine + relu.
    xm = jnp.mean(x, axis=(0, 2, 3), keepdims=True)
    xv = jnp.mean((x - xm) ** 2, axis=(0, 2, 3), keepdims=True)
    ref = (x - xm) / jnp.sqrt(xv + EPS)
    ref = ref * gamma.reshape(1, C, 1, 1) + beta.reshape(1, C, 1, 1)
    ref = jnp.maximum(ref, 0.0)

    assert out.shape == (N, C, H, W)
    assert jnp.max(jnp.abs(out - ref)) < 1e-4

    print("KERNEL_OK")
</pallas_src>

<mosaic_0001>
module attributes {stable_mosaic.version = 11 : i64} {
  func.func @_bn_relu_kernel(%arg0: i32, %arg1: memref<232x196xf32, #tpu.memory_space<vmem>>, %arg2: memref<232x2xf32, #tpu.memory_space<vmem>>, %arg3: memref<232x196xf32, #tpu.memory_space<vmem>>) attributes {dimension_semantics = [#tpu.dimension_semantics<parallel>], iteration_bounds = array<i64: 4>, scalar_prefetch = 0 : i64, scratch_operands = 0 : i64, tpu.core_type = #tpu.core_type<tc>, window_params = [{transform_indices = @transform_0, window_bounds = array<i64: 232, 196>}, {transform_indices = @transform_1, window_bounds = array<i64: 232, 2>}, {transform_indices = @transform_2, window_bounds = array<i64: 232, 196>}]} {
    %c0 = arith.constant 0 : index
    %c0_0 = arith.constant 0 : index
    %0 = vector.load %arg1[%c0, %c0_0] : memref<232x196xf32, #tpu.memory_space<vmem>>, vector<232x196xf32>
    %c0_1 = arith.constant 0 : index
    %c0_2 = arith.constant 0 : index
    %1 = vector.load %arg2[%c0_1, %c0_2] : memref<232x2xf32, #tpu.memory_space<vmem>>, vector<232x2xf32>
    %2 = vector.extract_strided_slice %1 {offsets = [0, 0], sizes = [232, 1], strides = [1, 1]} : vector<232x2xf32> to vector<232x1xf32>
    %3 = vector.extract_strided_slice %1 {offsets = [0, 1], sizes = [232, 1], strides = [1, 1]} : vector<232x2xf32> to vector<232x1xf32>
    %cst = arith.constant dense<0.000000e+00> : vector<232xf32>
    %4 = vector.multi_reduction <add>, %0, %cst [1] : vector<232x196xf32> to vector<232xf32>
    %5 = vector.shape_cast %4 : vector<232xf32> to vector<232x1xf32>
    %cst_3 = arith.constant 0.00510204071 : f32
    %6 = vector.broadcast %cst_3 : f32 to vector<232x1xf32>
    %7 = arith.mulf %5, %6 : vector<232x1xf32>
    %8 = vector.broadcast %7 : vector<232x1xf32> to vector<232x196xf32>
    %9 = arith.subf %0, %8 : vector<232x196xf32>
    %10 = arith.mulf %9, %9 : vector<232x196xf32>
    %cst_4 = arith.constant dense<0.000000e+00> : vector<232xf32>
    %11 = vector.multi_reduction <add>, %10, %cst_4 [1] : vector<232x196xf32> to vector<232xf32>
    %12 = vector.shape_cast %11 : vector<232xf32> to vector<232x1xf32>
    %cst_5 = arith.constant 0.00510204071 : f32
    %13 = vector.broadcast %cst_5 : f32 to vector<232x1xf32>
    %14 = arith.mulf %12, %13 : vector<232x1xf32>
    %cst_6 = arith.constant 9.99999974E-6 : f32
    %15 = vector.broadcast %cst_6 : f32 to vector<232x1xf32>
    %16 = arith.addf %14, %15 : vector<232x1xf32>
    %17 = math.rsqrt %16 : vector<232x1xf32>
    %18 = arith.mulf %2, %17 : vector<232x1xf32>
    %19 = vector.broadcast %18 : vector<232x1xf32> to vector<232x196xf32>
    %20 = arith.mulf %9, %19 : vector<232x196xf32>
    %21 = vector.broadcast %3 : vector<232x1xf32> to vector<232x196xf32>
    %22 = arith.addf %20, %21 : vector<232x196xf32>
    %cst_7 = arith.constant 0.000000e+00 : f32
    %23 = vector.broadcast %cst_7 : f32 to vector<232x196xf32>
    %24 = arith.maximumf %22, %23 : vector<232x196xf32>
    %c0_8 = arith.constant 0 : index
    %c0_9 = arith.constant 0 : index
    %25 = vector.load %arg3[%c0_8, %c0_9] : memref<232x196xf32, #tpu.memory_space<vmem>>, vector<232x196xf32>
    tpu.vector_store %arg3[%c0_8, %c0_9], %24 {strides = array<i32>} : memref<232x196xf32, #tpu.memory_space<vmem>>, vector<232x196xf32>,
    return
  }
  func.func @transform_0(%arg0: i32) -> (i32, i32) {
    %c0_i32 = arith.constant 0 : i32
    %c0_i32_0 = arith.constant 0 : i32
    return %arg0, %c0_i32 : i32, i32
  }
  func.func @transform_1(%arg0: i32) -> (i32, i32) {
    %c0_i32 = arith.constant 0 : i32
    %c0_i32_0 = arith.constant 0 : i32
    return %arg0, %c0_i32 : i32, i32
  }
  func.func @transform_2(%arg0: i32) -> (i32, i32) {
    %c0_i32 = arith.constant 0 : i32
    %c0_i32_0 = arith.constant 0 : i32
    return %arg0, %c0_i32 : i32, i32
  }
}

</mosaic_0001>

<bundles_post_ra>
// kernel: batchnorm_relu.1
= control target key start
LH: loop header
LB: loop body
LE: loop exit
PB: predicated region body
PF: predicated region fallthrough
CT: control target
= control target key end

     0   :  { %s1460_s9 = smov 0   ;;  %s2468_s0 = inlined_call_operand.vmem [shape: f32[928,196], index: 0, kind: input, shape index: {}, may-alias: {0,2}]   ;;  %s2469_s1 = inlined_call_operand.vmem [shape: f32[928,2], index: 1, kind: input, shape index: {}]   ;;  %s2470_s2 = inlined_call_operand.vmem [shape: f32[928,196], index: 2, kind: output, shape index: {}, may-alias: {0,2}]  }
   0x1 LB: > { %s1347_s10 = sadd.s32 4294967295, %s1441_s9   ;;  %p1351_p0 = scmp.ge.s32.totalorder %s1441_s9, 1  ;;  %s1441_s9 = sphi %s1460_s9, %s12_s9  }
   0x2   : > { %p125_p1 = scmp.lt.s32.totalorder %s1441_s9, 5 }
   0x4   : > { %p126_p2 = pnand %p1351_p0, %p125_p1 }
   0x6   : > { %129 = sbr.rel (%p126_p2) target bundleno = 534 (0x216), region = 28 }
   0xb   : > { %s154_s11 = smul.u32 29, %s1347_s10  ;;  %v2471_v0 = vmov 1   ;;  %vm261_vm0 = vcmask 556032  }
   0xc   : > { %1372 = vset.pattern.permute.xlu1 %v2471_v0  ;;  %1371 = vset.pattern.permute.xlu0 %v2471_v0 }
   0xd   : > { %p155_p3 = scmp.lt.s32.totalorder %s154_s11, 115 }
   0xf   : > { %s2694_s11 = smov (!%p155_p3, %s154_s11), 115 }
  0x10   : > { %s1359_s12 = sshll.u32 %s2694_s11, 4  ;;  %s1354_s16 = sshll.u32 %s2694_s11, 3 }
  0x11   : > { %s1478_s15 = scalar_lea.vmem %s2468_s0, %s1359_s12  ;;  %s1745_s19 = scalar_lea.vmem %s2469_s1, %s1354_s16 }
  0x12   : > { %v1481_v1 = vld [vmem:[%s1478_s15 + $0x20] sm:$0xff]  ;;  %v1484_v2 = vld [vmem:[%s1478_s15 + $0x28] sm:$0xff]  ;;  %v1495_v6 = vld [vmem:[%s1478_s15 + $0x30] sm:$0xff]  ;;  %s2268_s22 = scalar_lea.vmem %s2470_s2, %s1359_s12 }
  0x13   : > { %v1487_v3 = vld [vmem:[%s1478_s15] sm:$0xff]  ;;  %v270_v4 = vsel %vm261_vm0, %v1484_v2, 0.0  ;;  %v1492_v5 = vld [vmem:[%s1478_s15 + $0x8] sm:$0xff]  ;;  %v1498_v7 = vld [vmem:[%s1478_s15 + $0x38] sm:$0xff] }
  0x14   : > { %v271_v8 = vadd.f32 %v270_v4, %v1481_v1  ;;  %v262_v9 = vsel %vm261_vm0, %v1492_v5, 0.0  ;;  %v274_v10 = vsel %vm261_vm0, %v1498_v7, 0.0  ;;  %v1506_v11 = vld [vmem:[%s1478_s15 + $0x10] sm:$0xff]  ;;  %v1509_v12 = vld [vmem:[%s1478_s15 + $0x18] sm:$0xff]  ;;  %v1518_v16 = vld [vmem:[%s1478_s15 + $0x48] sm:$0xff] }
  0x15   : > { %v263_v13 = vadd.f32 %v262_v9, %v1487_v3  ;;  %v266_v14 = vsel %vm261_vm0, %v1509_v12, 0.0  ;;  %v1515_v15 = vld [vmem:[%s1478_s15 + $0x58] sm:$0xff]  ;;  %v275_v17 = vadd.f32 %v274_v10, %v1495_v6  ;;  %v1523_v19 = vld [vmem:[%s1478_s15 + $0x50] sm:$0xff]  ;;  %v1528_v21 = vld [vmem:[%s1478_s15 + $0x40] sm:$0xff]  ;;  %v278_v22 = vsel %vm261_vm0, %v1518_v16, 0.0 }
  0x16   : > { %272 = vadd.xlane.f32.xlu1 %v271_v8  ;;  %v267_v18 = vadd.f32 %v266_v14, %v1506_v11  ;;  %v282_v20 = vsel %vm261_vm0, %v1515_v15, 0.0  ;;  %v1533_v23 = vld [vmem:[%s1478_s15 + $0x78] sm:$0xff]  ;;  %v1536_v24 = vld [vmem:[%s1478_s15 + $0x68] sm:$0xff]  ;;  %v279_v26 = vadd.f32 %v278_v22, %v1528_v21  ;;  %v1541_v27 = vld [vmem:[%s1478_s15 + $0x70] sm:$0xff] }
  0x17   : > { %264 = vadd.xlane.f32.xlu0 %v263_v13  ;;  %v283_v25 = vadd.f32 %v282_v20, %v1523_v19  ;;  %v290_v28 = vsel %vm261_vm0, %v1533_v23, 0.0  ;;  %v1546_v29 = vld [vmem:[%s1478_s15 + $0x60] sm:$0xff]  ;;  %v286_v30 = vsel %vm261_vm0, %v1536_v24, 0.0  ;;  %v1551_v31 = vld [vmem:[%s1478_s15 + $0x98] sm:$0xff]  ;;  %v1554_v32 = vld [vmem:[%s1478_s15 + $0x88] sm:$0xff] }
  0x18   : > { %v291_v33 = vadd.f32 %v290_v28, %v1541_v27  ;;  %v287_v34 = vadd.f32 %v286_v30, %v1546_v29  ;;  %v1559_v35 = vld [vmem:[%s1478_s15 + $0x90] sm:$0xff]  ;;  %v298_v36 = vsel %vm261_vm0, %v1551_v31, 0.0  ;;  %v1564_v37 = vld [vmem:[%s1478_s15 + $0x80] sm:$0xff]  ;;  %v294_v38 = vsel %vm261_vm0, %v1554_v32, 0.0  ;;  %v1569_v39 = vld [vmem:[%s1478_s15 + $0xb8] sm:$0xff] }
  0x19   : > { %v1572_v40 = vld [vmem:[%s1478_s15 + $0xa8] sm:$0xff]  ;;  %v299_v41 = vadd.f32 %v298_v36, %v1559_v35  ;;  %v295_v42 = vadd.f32 %v294_v38, %v1564_v37  ;;  %v1577_v43 = vld [vmem:[%s1478_s15 + $0xb0] sm:$0xff]  ;;  %v306_v44 = vsel %vm261_vm0, %v1569_v39, 0.0  ;;  %v1582_v45 = vld [vmem:[%s1478_s15 + $0xa0] sm:$0xff] }
  0x1a   : > { %276 = vadd.xlane.f32.xlu1 %v275_v17  ;;  %v302_v46 = vsel %vm261_vm0, %v1572_v40, 0.0  ;;  %v1587_v47 = vld [vmem:[%s1478_s15 + $0xd8] sm:$0xff]  ;;  %v1590_v48 = vld [vmem:[%s1478_s15 + $0xc8] sm:$0xff]  ;;  %v307_v49 = vadd.f32 %v306_v44, %v1577_v43  ;;  %v1595_v51 = vld [vmem:[%s1478_s15 + $0xd0] sm:$0xff] }
  0x1b   : > { %268 = vadd.xlane.f32.xlu0 %v267_v18  ;;  %v303_v50 = vadd.f32 %v302_v46, %v1582_v45  ;;  %v314_v52 = vsel %vm261_vm0, %v1587_v47, 0.0  ;;  %v1600_v53 = vld [vmem:[%s1478_s15 + $0xc0] sm:$0xff]  ;;  %v310_v54 = vsel %vm261_vm0, %v1590_v48, 0.0  ;;  %v1605_v55 = vld [vmem:[%s1478_s15 + $0xf8] sm:$0xff]  ;;  %v1608_v56 = vld [vmem:[%s1478_s15 + $0xe8] sm:$0xff] }
  0x1c   : > { %v315_v57 = vadd.f32 %v314_v52, %v1595_v51  ;;  %v311_v58 = vadd.f32 %v310_v54, %v1600_v53  ;;  %v1613_v59 = vld [vmem:[%s1478_s15 + $0xf0] sm:$0xff]  ;;  %v322_v60 = vsel %vm261_vm0, %v1605_v55, 0.0  ;;  %v1618_v61 = vld [vmem:[%s1478_s15 + $0xe0] sm:$0xff]  ;;  %v318_v62 = vsel %vm261_vm0, %v1608_v56, 0.0  ;;  %v1623_v63 = vld [vmem:[%s1478_s15 + $0x118] sm:$0xff] }
  0x1d   : > { %v1626_v4 = vld [vmem:[%s1478_s15 + $0x108] sm:$0xff]  ;;  %v323_v8 = vadd.f32 %v322_v60, %v1613_v59  ;;  %v319_v9 = vadd.f32 %v318_v62, %v1618_v61  ;;  %v1631_v10 = vld [vmem:[%s1478_s15 + $0x110] sm:$0xff]  ;;  %v330_v13 = vsel %vm261_vm0, %v1623_v63, 0.0  ;;  %v1636_v14 = vld [vmem:[%s1478_s15 + $0x100] sm:$0xff] }
  0x1e   : > { %284 = vadd.xlane.f32.xlu1 %v283_v25  ;;  %v326_v17 = vsel %vm261_vm0, %v1626_v4, 0.0  ;;  %v1641_v18 = vld [vmem:[%s1478_s15 + $0x138] sm:$0xff]  ;;  %v1644_v20 = vld [vmem:[%s1478_s15 + $0x128] sm:$0xff]  ;;  %v331_v22 = vadd.f32 %v330_v13, %v1631_v10  ;;  %v1654_v30 = vld [vmem:[%s1478_s15 + $0x120] sm:$0xff] }
  0x1f   : > { %280 = vadd.xlane.f32.xlu0 %v279_v26  ;;  %v327_v25 = vadd.f32 %v326_v17, %v1636_v14  ;;  %v1649_v26 = vld [vmem:[%s1478_s15 + $0x130] sm:$0xff]  ;;  %v338_v28 = vsel %vm261_vm0, %v1641_v18, 0.0  ;;  %v1662_v36 = vld [vmem:[%s1478_s15 + $0x148] sm:$0xff]  ;;  %v1672_v46 = vld [vmem:[%s1478_s15 + $0x140] sm:$0xff] }
  0x20   : > { %v339_v38 = vadd.f32 %v338_v28, %v1649_v26  ;;  %v1680_v52 = vld [vmem:[%s1478_s15 + $0x168] sm:$0xff]  ;;  %v1690_v62 = vld [vmem:[%s1478_s15 + $0x160] sm:$0xff] }
  0x21   : > { %v1698_v13 = vld [vmem:[%s1478_s15 + $0x188] sm:$0xff] }
  0x22   : > { %292 = vadd.xlane.f32.xlu1 %v291_v33  ;;  %v334_v33 = vsel %vm261_vm0, %v1644_v20, 0.0  ;;  %2546 = vst [vmem:[#allocation2_spill] sm:$0xff] %v1698_v13 }
  0x23   : > { %288 = vadd.xlane.f32.xlu0 %v287_v34  ;;  %v1659_v34 = vld [vmem:[%s1478_s15 + $0x158] sm:$0xff] }
  0x24   : > { %v346_v44 = vsel %vm261_vm0, %v1659_v34, 0.0 }
  0x26   : > { %300 = vadd.xlane.f32.xlu1 %v299_v41  ;;  %v335_v41 = vadd.f32 %v334_v33, %v1654_v30  ;;  %v1708_v33 = vld [vmem:[%s1478_s15 + $0x180] sm:$0xff] }
  0x27   : > { %296 = vadd.xlane.f32.xlu0 %v295_v42  ;;  %v1667_v42 = vld [vmem:[%s1478_s15 + $0x150] sm:$0xff] }
  0x28   : > { %v347_v54 = vadd.f32 %v346_v44, %v1667_v42  ;;  %v1716_v44 = vld [vmem:[%s1478_s15 + $0x1a8] sm:$0xff] }
  0x29   : > { %2548 = vst [vmem:[#allocation4_spill] sm:$0xff] %v1716_v44  ;;  %v366_v0 = vsel %vm261_vm0, %v1716_v44, 0.0 }
  0x2a   : > { %308 = vadd.xlane.f32.xlu1 %v307_v49  ;;  %v342_v49 = vsel %vm261_vm0, %v1662_v36, 0.0 }
  0x2b   : > { %304 = vadd.xlane.f32.xlu0 %v303_v50  ;;  %v1677_v50 = vld [vmem:[%s1478_s15 + $0x178] sm:$0xff] }
  0x2c   : > { %v354_v60 = vsel %vm261_vm0, %v1677_v50, 0.0 }
  0x2e   : > { %316 = vadd.xlane.f32.xlu1 %v315_v57  ;;  %v343_v57 = vadd.f32 %v342_v49, %v1672_v46 }
  0x2f   : > { %312 = vadd.xlane.f32.xlu0 %v311_v58  ;;  %v1685_v58 = vld [vmem:[%s1478_s15 + $0x170] sm:$0xff] }
  0x30   : > { %v355_v17 = vadd.f32 %v354_v60, %v1685_v58 }
  0x32   : > { %324 = vadd.xlane.f32.xlu1 %v323_v8  ;;  %v350_v8 = vsel %vm261_vm0, %v1680_v52, 0.0 }
  0x33   : > { %320 = vadd.xlane.f32.xlu0 %v319_v9  ;;  %v1695_v9 = vld [vmem:[%s1478_s15 + $0x198] sm:$0xff] }
  0x34   : > { %v362_v28 = vsel %vm261_vm0, %v1695_v9, 0.0 }
  0x36   : > { %332 = vadd.xlane.f32.xlu1 %v331_v22  ;;  %v351_v22 = vadd.f32 %v350_v8, %v1690_v62  ;;  %v1726_v8 = vld [vmem:[%s1478_s15 + $0x1a0] sm:$0xff] }
  0x37   : > { %328 = vadd.xlane.f32.xlu0 %v327_v25  ;;  %v1703_v25 = vld [vmem:[%s1478_s15 + $0x190] sm:$0xff]  ;;  %2549 = vst [vmem:[#allocation5_spill] sm:$0xff] %v1726_v8 }
  0x38   : > { %v363_v49 = vadd.f32 %v362_v28, %v1703_v25  ;;  %v1736_v28 = vld [vmem:[%s1478_s15 + $0x1c0] sm:$0xff] }
  0x39   : > { %2551 = vst [vmem:[#allocation7_spill] sm:$0xff] %v1736_v28 }
  0x3a   : > { %340 = vadd.xlane.f32.xlu1 %v339_v38  ;;  %v358_v38 = vsel %vm261_vm0, %v1698_v13, 0.0  ;;  %v1731_v13 = vld [vmem:[%s1478_s15 + $0x1c8] sm:$0xff] }
  0x3b   : > { %336 = vadd.xlane.f32.xlu0 %v335_v41  ;;  %v1713_v41 = vld [vmem:[%s1478_s15 + $0x1b8] sm:$0xff]  ;;  %2550 = vst [vmem:[#allocation6_spill] sm:$0xff] %v1731_v13 }
  0x3c   : > { %2547 = vst [vmem:[#allocation3_spill] sm:$0xff] %v1713_v41  ;;  %v370_v60 = vsel %vm261_vm0, %v1713_v41, 0.0 }
  0x3e   : > { %348 = vadd.xlane.f32.xlu1 %v347_v54  ;;  %v359_v54 = vadd.f32 %v358_v38, %v1708_v33  ;;  %v374_v38 = vsel %vm261_vm0, %v1731_v13, 0.0 }
  0x3f   : > { %344 = vadd.xlane.f32.xlu0 %v343_v57  ;;  %v1721_v57 = vld [vmem:[%s1478_s15 + $0x1b0] sm:$0xff]  ;;  %v375_v41 = vadd.f32 %v374_v38, %v1736_v28  ;;  %v1775_v38 = vld [vmem:[%s1745_s19 + $0x28] sm:$0xff] }
  0x40   : > { %2559 = vst [vmem:[#allocation15_spill] sm:$0xff] %v1775_v38 }
  0x42   : > { %356 = vadd.xlane.f32.xlu1 %v355_v17  ;;  %v371_v17 = vadd.f32 %v370_v60, %v1721_v57  ;;  %v1763_v60 = vld [vmem:[%s1745_s19 + $0x30] sm:$0xff] }
  0x43   : > { %352 = vadd.xlane.f32.xlu0 %v351_v22  ;;  %v367_v22 = vadd.f32 %v366_v0, %v1726_v8  ;;  %v1748_v0 = vld [vmem:[%s1745_s19 + $0x8] sm:$0xff]  ;;  %2556 = vst [vmem:[#allocation12_spill] sm:$0xff] %v1763_v60 }
  0x44   : > { %2552 = vst [vmem:[#allocation8_spill] sm:$0xff] %v1748_v0 }
  0x46   : > { %364 = vadd.xlane.f32.xlu1 %v363_v49  ;;  %v1756_v49 = vld [vmem:[%s1745_s19 + $0x20] sm:$0xff] }
  0x47   : > { %360 = vadd.xlane.f32.xlu0 %v359_v54  ;;  %2554 = vst [vmem:[#allocation10_spill] sm:$0xff] %v1756_v49  ;;  %v1759_v54 = vld [vmem:[%s1745_s19] sm:$0xff] }
  0x48   : > { %2555 = vst [vmem:[#allocation11_spill] sm:$0xff] %v1759_v54 }
  0x4a   : > { %372 = vadd.xlane.f32.xlu1 %v371_v17  ;;  %v1767_v17 = vld [vmem:[%s1745_s19 + $0x18] sm:$0xff] }
  0x4b   : > { %368 = vadd.xlane.f32.xlu0 %v367_v22  ;;  %2557 = vst [vmem:[#allocation13_spill] sm:$0xff] %v1767_v17  ;;  %v1771_v22 = vld [vmem:[%s1745_s19 + $0x40] sm:$0xff] }
  0x4c   : > { %2558 = vst [vmem:[#allocation14_spill] sm:$0xff] %v1771_v22 }
  0x4f   : > { %376 = vadd.xlane.f32.xlu0 %v375_v41  ;;  %v1752_v41 = vld [vmem:[%s1745_s19 + $0x10] sm:$0xff] }
  0x50   : > { %2553 = vst [vmem:[#allocation9_spill] sm:$0xff] %v1752_v41 }
  0x5b   : > { %965 = vperm.xlu1 %1372, %v1748_v0   ;;  %v1807_v0 = vld [vmem:[%s1745_s19 + $0x68] sm:$0xff] }
  0x5c   : > { %2567 = vst [vmem:[#allocation23_spill] sm:$0xff] %v1807_v0 }
  0x5f   : > { %970 = vperm.xlu1 %1372, %v1752_v41   ;;  %v1783_v41 = vld [vmem:[%s1745_s19 + $0x38] sm:$0xff] }
  0x60   : > { %2561 = vst [vmem:[#allocation17_spill] sm:$0xff] %v1783_v41 }
  0x63   : > { %980 = vperm.xlu1 %1372, %v1756_v49   ;;  %v1779_v49 = vld [vmem:[%s1745_s19 + $0x50] sm:$0xff] }
  0x64   : > { %2560 = vst [vmem:[#allocation16_spill] sm:$0xff] %v1779_v49 }
  0x65   : > { %960 = vperm.xlu0 %1371, %v1759_v54  }
  0x67   : > { %990 = vperm.xlu1 %1372, %v1763_v60   ;;  %v1787_v60 = vld [vmem:[%s1745_s19 + $0x60] sm:$0xff] }
  0x68   : > { %2562 = vst [vmem:[#allocation18_spill] sm:$0xff] %v1787_v60 }
  0x69   : > { %975 = vperm.xlu0 %1371, %v1767_v17   ;;  %v1791_v17 = vld [vmem:[%s1745_s19 + $0x48] sm:$0xff] }
  0x6a   : > { %2563 = vst [vmem:[#allocation19_spill] sm:$0xff] %v1791_v17 }
  0x6b   : > { %1000 = vperm.xlu1 %1372, %v1771_v22   ;;  %v1795_v22 = vld [vmem:[%s1745_s19 + $0x70] sm:$0xff] }
  0x6c   : > { %2564 = vst [vmem:[#allocation20_spill] sm:$0xff] %v1795_v22 }
  0x6d   : > { %985 = vperm.xlu0 %1371, %v1775_v38   ;;  %v1799_v38 = vld [vmem:[%s1745_s19 + $0x58] sm:$0xff] }
  0x6e   : > { %2565 = vst [vmem:[#allocation21_spill] sm:$0xff] %v1799_v38 }
  0x6f   : > { %1010 = vperm.xlu1 %1372, %v1779_v49   ;;  %v1803_v49 = vld [vmem:[%s1745_s19 + $0x80] sm:$0xff] }
  0x70   : > { %2566 = vst [vmem:[#allocation22_spill] sm:$0xff] %v1803_v49 }
  0x71   : > { %995 = vperm.xlu0 %1371, %v1783_v41   ;;  %v1811_v41 = vld [vmem:[%s1745_s19 + $0x90] sm:$0xff] }
  0x72   : > { %2568 = vst [vmem:[#allocation24_spill] sm:$0xff] %v1811_v41 }
  0x73   : > { %1020 = vperm.xlu1 %1372, %v1787_v60   ;;  %v1815_v60 = vld [vmem:[%s1745_s19 + $0x78] sm:$0xff] }
  0x74   : > { %2569 = vst [vmem:[#allocation25_spill] sm:$0xff] %v1815_v60 }
  0x75   : > { %1005 = vperm.xlu0 %1371, %v1791_v17   ;;  %v1819_v17 = vld [vmem:[%s1745_s19 + $0xa0] sm:$0xff] }
  0x76   : > { %2570 = vst [vmem:[#allocation26_spill] sm:$0xff] %v1819_v17 }
  0x77   : > { %1030 = vperm.xlu1 %1372, %v1795_v22   ;;  %v1823_v22 = vld [vmem:[%s1745_s19 + $0x88] sm:$0xff] }
  0x78   : > { %2571 = vst [vmem:[#allocation27_spill] sm:$0xff] %v1823_v22 }
  0x79   : > { %1015 = vperm.xlu0 %1371, %v1799_v38   ;;  %v1828_v38 = vld [vmem:[%s1745_s19 + $0x98] sm:$0xff] }
  0x7a   : > { %2572 = vst [vmem:[#allocation28_spill] sm:$0xff] %v1828_v38 }
  0x7b   : > { %1040 = vperm.xlu1 %1372, %v1803_v49  }
  0x7d   : > { %1025 = vperm.xlu0 %1371, %v1807_v0  }
  0x7f   : > { %1050 = vperm.xlu1 %1372, %v1811_v41  }
  0x81   : > { %1035 = vperm.xlu0 %1371, %v1815_v60  }
  0x83   : > { %1060 = vperm.xlu1 %1372, %v1819_v17  }
  0x85   : > { %1045 = vperm.xlu0 %1371, %v1823_v22  }
  0x89   : > { %1055 = vperm.xlu0 %1371, %v1828_v38  }
  0x9f   : > { %v273_v49 = vpop.xlane.xlu1 %272 }
  0xa0   : > { %v380_v0 = vmul.f32 0.0051020407, %v273_v49  ;;  %v265_v54 = vpop.xlane.xlu0 %264 }
  0xa1   : > { %v378_v13 = vmul.f32 0.0051020407, %v265_v54 }
  0xa2   : > { %v1832_v41 = vsub.f32 %v1481_v1, %v380_v0  ;;  %v1835_v28 = vsub.f32 %v1484_v2, %v380_v0 }
  0xa3   : > { %v1838_v60 = vsub.f32 %v1487_v3, %v378_v13  ;;  %v1841_v17 = vsub.f32 %v1492_v5, %v378_v13  ;;  %v277_v22 = vpop.xlane.xlu1 %276 }
  0xa4   : > { %2573 = vst [vmem:[#allocation29_spill] sm:$0xff] %v1832_v41  ;;  %2574 = vst [vmem:[#allocation30_spill] sm:$0xff] %v1835_v28  ;;  %v381_v44 = vmul.f32 0.0051020407, %v277_v22  ;;  %v269_v8 = vpop.xlane.xlu0 %268  ;;  %v470_v49 = vmul.f32 %v1835_v28, %v1835_v28  ;;  %v469_v5 = vmul.f32 %v1832_v41, %v1832_v41 }
  0xa5   : > { %2575 = vst [vmem:[#allocation31_spill] sm:$0xff] %v1838_v60  ;;  %2576 = vst [vmem:[#allocation32_spill] sm:$0xff] %v1841_v17  ;;  %v379_v38 = vmul.f32 0.0051020407, %v269_v8  ;;  %v465_v1 = vmul.f32 %v1838_v60, %v1838_v60  ;;  %v466_v2 = vmul.f32 %v1841_v17, %v1841_v17 }
  0xa6   : > { %v1850_v0 = vsub.f32 %v1495_v6, %v381_v44  ;;  %v1853_v3 = vsub.f32 %v1498_v7, %v381_v44  ;;  %v531_v28 = vsel %vm261_vm0, %v470_v49, 0.0 }
  0xa7   : > { %v1858_v13 = vsub.f32 %v1506_v11, %v379_v38  ;;  %v1861_v8 = vsub.f32 %v1509_v12, %v379_v38  ;;  %v285_v54 = vpop.xlane.xlu1 %284  ;;  %v523_v22 = vsel %vm261_vm0, %v466_v2, 0.0 }
  0xa8   : > { %2577 = vst [vmem:[#allocation33_spill] sm:$0xff] %v1850_v0  ;;  %2578 = vst [vmem:[#allocation34_spill] sm:$0xff] %v1853_v3  ;;  %v383_v17 = vmul.f32 0.0051020407, %v285_v54  ;;  %v281_v6 = vpop.xlane.xlu0 %280  ;;  %v524_v60 = vadd.f32 %v523_v22, %v465_v1  ;;  %v472_v7 = vmul.f32 %v1853_v3, %v1853_v3  ;;  %v471_v12 = vmul.f32 %v1850_v0, %v1850_v0 }
  0xa9   : > { %2579 = vst [vmem:[#allocation35_spill] sm:$0xff] %v1861_v8  ;;  %v382_v44 = vmul.f32 0.0051020407, %v281_v6  ;;  %v467_v41 = vmul.f32 %v1858_v13, %v1858_v13  ;;  %v468_v11 = vmul.f32 %v1861_v8, %v1861_v8  ;;  %v532_v1 = vadd.f32 %v531_v28, %v469_v5 }
  0xaa   : > { %v1874_v38 = vsub.f32 %v1523_v19, %v383_v17  ;;  %v1877_v49 = vsub.f32 %v1515_v15, %v383_v17  ;;  %525 = vadd.xlane.f32.xlu1 %v524_v60  ;;  %v535_v2 = vsel %vm261_vm0, %v472_v7, 0.0 }
  0xab   : > { %v1881_v54 = vsub.f32 %v1528_v21, %v382_v44  ;;  %v1884_v22 = vsub.f32 %v1518_v16, %v382_v44  ;;  %v293_v6 = vpop.xlane.xlu1 %292  ;;  %v527_v3 = vsel %vm261_vm0, %v468_v11, 0.0  ;;  %v536_v60 = vadd.f32 %v535_v2, %v471_v12 }
  0xac   : > { %v385_v0 = vmul.f32 0.0051020407, %v293_v6  ;;  %v289_v8 = vpop.xlane.xlu0 %288  ;;  %v528_v19 = vadd.f32 %v527_v3, %v467_v41  ;;  %v476_v15 = vmul.f32 %v1877_v49, %v1877_v49  ;;  %v475_v41 = vmul.f32 %v1874_v38, %v1874_v38 }
  0xad   : > { %v384_v17 = vmul.f32 0.0051020407, %v289_v8  ;;  %v473_v28 = vmul.f32 %v1881_v54, %v1881_v54  ;;  %v474_v21 = vmul.f32 %v1884_v22, %v1884_v22 }
  0xae   : > { %v1894_v16 = vsub.f32 %v1541_v27, %v385_v0  ;;  %v1897_v5 = vsub.f32 %v1533_v23, %v385_v0  ;;  %533 = vadd.xlane.f32.xlu1 %v532_v1  ;;  %529 = vadd.xlane.f32.xlu0 %v528_v19  ;;  %v543_v27 = vsel %vm261_vm0, %v476_v15, 0.0 }
  0xaf   : > { %v1902_v3 = vsub.f32 %v1546_v29, %v384_v17  ;;  %v1905_v8 = vsub.f32 %v1536_v24, %v384_v17  ;;  %v301_v7 = vpop.xlane.xlu1 %300  ;;  %v539_v44 = vsel %vm261_vm0, %v474_v21, 0.0  ;;  %v544_v15 = vadd.f32 %v543_v27, %v475_v41 }
  0xb0   : > { %2580 = vst [vmem:[#allocation36_spill] sm:$0xff] %v1897_v5  ;;  %v387_v11 = vmul.f32 0.0051020407, %v301_v7  ;;  %v297_v12 = vpop.xlane.xlu0 %296  ;;  %v540_v23 = vadd.f32 %v539_v44, %v473_v28  ;;  %v480_v0 = vmul.f32 %v1897_v5, %v1897_v5  ;;  %v479_v24 = vmul.f32 %v1894_v16, %v1894_v16 }
  0xb1   : > { %v386_v1 = vmul.f32 0.0051020407, %v297_v12  ;;  %v477_v2 = vmul.f32 %v1902_v3, %v1902_v3  ;;  %v478_v29 = vmul.f32 %v1905_v8, %v1905_v8 }
  0xb2   : > { %v1918_v6 = vsub.f32 %v1559_v35, %v387_v11  ;;  %v1921_v19 = vsub.f32 %v1551_v31, %v387_v11  ;;  %537 = vadd.xlane.f32.xlu0 %v536_v60  ;;  %541 = vadd.xlane.f32.xlu1 %v540_v23  ;;  %v551_v17 = vsel %vm261_vm0, %v480_v0, 0.0 }
  0xb3   : > { %v1925_v28 = vsub.f32 %v1564_v37, %v386_v1  ;;  %v1928_v21 = vsub.f32 %v1554_v32, %v386_v1  ;;  %v309_v7 = vpop.xlane.xlu1 %308  ;;  %v547_v44 = vsel %vm261_vm0, %v478_v29, 0.0  ;;  %v552_v11 = vadd.f32 %v551_v17, %v479_v24 }
  0xb4   : > { %v389_v12 = vmul.f32 0.0051020407, %v309_v7  ;;  %v305_v35 = vpop.xlane.xlu0 %304  ;;  %v548_v5 = vadd.f32 %v547_v44, %v477_v2  ;;  %v484_v31 = vmul.f32 %v1921_v19, %v1921_v19  ;;  %v483_v23 = vmul.f32 %v1918_v6, %v1918_v6 }
  0xb5   : > { %v388_v60 = vmul.f32 0.0051020407, %v305_v35  ;;  %v481_v41 = vmul.f32 %v1925_v28, %v1925_v28  ;;  %v482_v37 = vmul.f32 %v1928_v21, %v1928_v21 }
  0xb6   : > { %v1938_v32 = vsub.f32 %v1577_v43, %v389_v12  ;;  %v1941_v27 = vsub.f32 %v1569_v39, %v389_v12  ;;  %545 = vadd.xlane.f32.xlu0 %v544_v15  ;;  %549 = vadd.xlane.f32.xlu1 %v548_v5  ;;  %v559_v43 = vsel %vm261_vm0, %v484_v31, 0.0 }
  0xb7   : > { %v1946_v0 = vsub.f32 %v1582_v45, %v388_v60  ;;  %v1949_v1 = vsub.f32 %v1572_v40, %v388_v60  ;;  %v317_v2 = vpop.xlane.xlu1 %316  ;;  %v555_v29 = vsel %vm261_vm0, %v482_v37, 0.0  ;;  %v560_v35 = vadd.f32 %v559_v43, %v483_v23 }
  0xb8   : > { %v391_v24 = vmul.f32 0.0051020407, %v317_v2  ;;  %v313_v17 = vpop.xlane.xlu0 %312  ;;  %v556_v39 = vadd.f32 %v555_v29, %v481_v41  ;;  %v488_v5 = vmul.f32 %v1941_v27, %v1941_v27  ;;  %v487_v40 = vmul.f32 %v1938_v32, %v1938_v32 }
  0xb9   : > { %v390_v15 = vmul.f32 0.0051020407, %v313_v17  ;;  %v485_v7 = vmul.f32 %v1946_v0, %v1946_v0  ;;  %v486_v45 = vmul.f32 %v1949_v1, %v1949_v1 }
  0xba   : > { %v1962_v44 = vsub.f32 %v1595_v51, %v391_v24  ;;  %v1965_v12 = vsub.f32 %v1587_v47, %v391_v24  ;;  %553 = vadd.xlane.f32.xlu0 %v552_v11  ;;  %557 = vadd.xlane.f32.xlu1 %v556_v39  ;;  %v567_v31 = vsel %vm261_vm0, %v488_v5, 0.0 }
  0xbb   : > { %v1969_v60 = vsub.f32 %v1600_v53, %v390_v15  ;;  %v1972_v41 = vsub.f32 %v1590_v48, %v390_v15  ;;  %v325_v37 = vpop.xlane.xlu1 %324  ;;  %v563_v2 = vsel %vm261_vm0, %v486_v45, 0.0  ;;  %v568_v24 = vadd.f32 %v567_v31, %v487_v40 }
  0xbc   : > { %v393_v29 = vmul.f32 0.0051020407, %v325_v37  ;;  %v321_v51 = vpop.xlane.xlu0 %320  ;;  %v564_v17 = vadd.f32 %v563_v2, %v485_v7  ;;  %v492_v47 = vmul.f32 %v1965_v12, %v1965_v12  ;;  %v491_v39 = vmul.f32 %v1962_v44, %v1962_v44 }
  0xbd   : > { %2581 = vst [vmem:[#allocation37_spill] sm:$0xff] %v1969_v60  ;;  %2582 = vst [vmem:[#allocation38_spill] sm:$0xff] %v1972_v41  ;;  %v392_v11 = vmul.f32 0.0051020407, %v321_v51  ;;  %v489_v23 = vmul.f32 %v1969_v60, %v1969_v60  ;;  %v490_v53 = vmul.f32 %v1972_v41, %v1972_v41 }
  0xbe   : > { %v1982_v48 = vsub.f32 %v1613_v59, %v393_v29  ;;  %v1985_v43 = vsub.f32 %v1605_v55, %v393_v29  ;;  %561 = vadd.xlane.f32.xlu0 %v560_v35  ;;  %565 = vadd.xlane.f32.xlu1 %v564_v17  ;;  %v575_v59 = vsel %vm261_vm0, %v492_v47, 0.0 }
  0xbf   : > { %v1990_v5 = vsub.f32 %v1618_v61, %v392_v11  ;;  %v1993_v15 = vsub.f32 %v1608_v56, %v392_v11  ;;  %v333_v7 = vpop.xlane.xlu1 %332  ;;  %v571_v45 = vsel %vm261_vm0, %v490_v53, 0.0  ;;  %v576_v17 = vadd.f32 %v575_v59, %v491_v39 }
  0xc0   : > { %v395_v40 = vmul.f32 0.0051020407, %v333_v7  ;;  %v329_v31 = vpop.xlane.xlu0 %328  ;;  %v572_v55 = vadd.f32 %v571_v45, %v489_v23  ;;  %v496_v35 = vmul.f32 %v1985_v43, %v1985_v43  ;;  %v495_v56 = vmul.f32 %v1982_v48, %v1982_v48 }
  0xc1   : > { %2583 = vst [vmem:[#allocation39_spill] sm:$0xff] %v1990_v5  ;;  %2584 = vst [vmem:[#allocation40_spill] sm:$0xff] %v1993_v15  ;;  %v394_v37 = vmul.f32 0.0051020407, %v329_v31  ;;  %v493_v2 = vmul.f32 %v1990_v5, %v1990_v5  ;;  %v494_v61 = vmul.f32 %v1993_v15, %v1993_v15 }
  0xc2   : > { %v2006_v29 = vsub.f32 %v1631_v10, %v395_v40  ;;  %v2009_v51 = vsub.f32 %v1623_v63, %v395_v40  ;;  %569 = vadd.xlane.f32.xlu0 %v568_v24  ;;  %573 = vadd.xlane.f32.xlu1 %v572_v55  ;;  %v583_v47 = vsel %vm261_vm0, %v496_v35, 0.0 }
  0xc3   : > { %v2013_v11 = vsub.f32 %v1636_v14, %v394_v37  ;;  %v2016_v23 = vsub.f32 %v1626_v4, %v394_v37  ;;  %v341_v53 = vpop.xlane.xlu1 %340  ;;  %v579_v7 = vsel %vm261_vm0, %v494_v61, 0.0  ;;  %v584_v40 = vadd.f32 %v583_v47, %v495_v56 }
  0xc4   : > { %2585 = vst [vmem:[#allocation41_spill] sm:$0xff] %v2006_v29  ;;  %2586 = vst [vmem:[#allocation42_spill] sm:$0xff] %v2009_v51  ;;  %v397_v45 = vmul.f32 0.0051020407, %v341_v53  ;;  %v337_v10 = vpop.xlane.xlu0 %336  ;;  %v580_v31 = vadd.f32 %v579_v7, %v493_v2  ;;  %v500_v63 = vmul.f32 %v2009_v51, %v2009_v51  ;;  %v499_v55 = vmul.f32 %v2006_v29, %v2006_v29 }
  0xc5   : > { %2587 = vst [vmem:[#allocation43_spill] sm:$0xff] %v2013_v11  ;;  %2588 = vst [vmem:[#allocation44_spill] sm:$0xff] %v2016_v23  ;;  %v396_v24 = vmul.f32 0.0051020407, %v337_v10  ;;  %v497_v39 = vmul.f32 %v2013_v11, %v2013_v11  ;;  %v498_v14 = vmul.f32 %v2016_v23, %v2016_v23 }
  0xc6   : > { %v2026_v4 = vsub.f32 %v1649_v26, %v397_v45  ;;  %v2029_v59 = vsub.f32 %v1641_v18, %v397_v45  ;;  %577 = vadd.xlane.f32.xlu0 %v576_v17  ;;  %581 = vadd.xlane.f32.xlu1 %v580_v31  ;;  %v591_v26 = vsel %vm261_vm0, %v500_v63, 0.0 }
  0xc7   : > { %v2034_v35 = vsub.f32 %v1654_v30, %v396_v24  ;;  %v2037_v37 = vsub.f32 %v1644_v20, %v396_v24  ;;  %v349_v2 = vpop.xlane.xlu1 %348  ;;  %v587_v61 = vsel %vm261_vm0, %v498_v14, 0.0  ;;  %v592_v31 = vadd.f32 %v591_v26, %v499_v55 }
  0xc8   : > { %2589 = vst [vmem:[#allocation45_spill] sm:$0xff] %v2026_v4  ;;  %2590 = vst [vmem:[#allocation46_spill] sm:$0xff] %v2029_v59  ;;  %v399_v56 = vmul.f32 0.0051020407, %v349_v2  ;;  %v345_v47 = vpop.xlane.xlu0 %344  ;;  %v588_v18 = vadd.f32 %v587_v61, %v497_v39  ;;  %v504_v17 = vmul.f32 %v2029_v59, %v2029_v59  ;;  %v503_v20 = vmul.f32 %v2026_v4, %v2026_v4 }
  0xc9   : > { %2591 = vst [vmem:[#allocation47_spill] sm:$0xff] %v2034_v35  ;;  %2592 = vst [vmem:[#allocation48_spill] sm:$0xff] %v2037_v37  ;;  %v398_v53 = vmul.f32 0.0051020407, %v345_v47  ;;  %v501_v7 = vmul.f32 %v2034_v35, %v2034_v35  ;;  %v502_v30 = vmul.f32 %v2037_v37, %v2037_v37 }
  0xca   : > { %v2050_v45 = vsub.f32 %v1667_v42, %v399_v56  ;;  %v2053_v10 = vsub.f32 %v1659_v34, %v399_v56  ;;  %585 = vadd.xlane.f32.xlu0 %v584_v40  ;;  %589 = vadd.xlane.f32.xlu1 %v588_v18  ;;  %v599_v63 = vsel %vm261_vm0, %v504_v17, 0.0 }
  0xcb   : > { %v2057_v24 = vsub.f32 %v1672_v46, %v398_v53  ;;  %v2060_v39 = vsub.f32 %v1662_v36, %v398_v53  ;;  %v357_v14 = vpop.xlane.xlu1 %356  ;;  %v595_v2 = vsel %vm261_vm0, %v502_v30, 0.0  ;;  %v600_v56 = vadd.f32 %v599_v63, %v503_v20 }
  0xcc   : > { %2593 = vst [vmem:[#allocation49_spill] sm:$0xff] %v2050_v45  ;;  %2594 = vst [vmem:[#allocation50_spill] sm:$0xff] %v2053_v10  ;;  %v401_v61 = vmul.f32 0.0051020407, %v357_v14  ;;  %v353_v42 = vpop.xlane.xlu0 %352  ;;  %v596_v47 = vadd.f32 %v595_v2, %v501_v7  ;;  %v508_v34 = vmul.f32 %v2053_v10, %v2053_v10  ;;  %v507_v18 = vmul.f32 %v2050_v45, %v2050_v45 }
  0xcd   : > { %2595 = vst [vmem:[#allocation51_spill] sm:$0xff] %v2057_v24  ;;  %2596 = vst [vmem:[#allocation52_spill] sm:$0xff] %v2060_v39  ;;  %v400_v40 = vmul.f32 0.0051020407, %v353_v42  ;;  %v505_v55 = vmul.f32 %v2057_v24, %v2057_v24  ;;  %v506_v46 = vmul.f32 %v2060_v39, %v2060_v39 }
  0xce   : > { %v2070_v36 = vsub.f32 %v1685_v58, %v401_v61  ;;  %v2073_v26 = vsub.f32 %v1677_v50, %v401_v61  ;;  %593 = vadd.xlane.f32.xlu0 %v592_v31  ;;  %597 = vadd.xlane.f32.xlu1 %v596_v47  ;;  %v607_v58 = vsel %vm261_vm0, %v508_v34, 0.0 }
  0xcf   : > { %v2078_v17 = vsub.f32 %v1690_v62, %v400_v40  ;;  %v2081_v53 = vsub.f32 %v1680_v52, %v400_v40  ;;  %v365_v7 = vpop.xlane.xlu1 %364  ;;  %v603_v30 = vsel %vm261_vm0, %v506_v46, 0.0  ;;  %v608_v47 = vadd.f32 %v607_v58, %v507_v18 }
  0xd0   : > { %2597 = vst [vmem:[#allocation53_spill] sm:$0xff] %v2070_v36  ;;  %2598 = vst [vmem:[#allocation54_spill] sm:$0xff] %v2073_v26  ;;  %v403_v20 = vmul.f32 0.0051020407, %v365_v7  ;;  %v361_v63 = vpop.xlane.xlu0 %360  ;;  %v604_v50 = vadd.f32 %v603_v30, %v505_v55  ;;  %v512_v31 = vmul.f32 %v2073_v26, %v2073_v26  ;;  %v511_v52 = vmul.f32 %v2070_v36, %v2070_v36  ;;  %v2604_v55 = vld [vmem:[#allocation2_spill] sm:$0xff] }
  0xd1   : > { %2599 = vst [vmem:[#allocation55_spill] sm:$0xff] %v2078_v17  ;;  %2600 = vst [vmem:[#allocation56_spill] sm:$0xff] %v2081_v53  ;;  %v402_v14 = vmul.f32 0.0051020407, %v361_v63  ;;  %v509_v2 = vmul.f32 %v2078_v17, %v2078_v17  ;;  %v510_v62 = vmul.f32 %v2081_v53, %v2081_v53 }
  0xd2   : > { %v2094_v61 = vsub.f32 %v1703_v25, %v403_v20  ;;  %v2097_v42 = vsub.f32 %v1695_v9, %v403_v20  ;;  %601 = vadd.xlane.f32.xlu0 %v600_v56  ;;  %605 = vadd.xlane.f32.xlu1 %v604_v50  ;;  %v615_v34 = vsel %vm261_vm0, %v512_v31, 0.0  ;;  %v2607_v50 = vld [vmem:[#allocation3_spill] sm:$0xff] }
  0xd3   : > { %v2101_v40 = vsub.f32 %v1708_v33, %v402_v14  ;;  %v2104_v46 = vsub.f32 %v2604_v55, %v402_v14  ;;  %v373_v7 = vpop.xlane.xlu1 %372  ;;  %v611_v30 = vsel %vm261_vm0, %v510_v62, 0.0  ;;  %v616_v20 = vadd.f32 %v615_v34, %v511_v52  ;;  %v2611_v52 = vld [vmem:[#allocation4_spill] sm:$0xff] }
  0xd4   : > { %2601 = vst [vmem:[#allocation57_spill] sm:$0xff] %v2094_v61  ;;  %2602 = vst [vmem:[#allocation58_spill] sm:$0xff] %v2097_v42  ;;  %v405_v63 = vmul.f32 0.0051020407, %v373_v7  ;;  %v369_v25 = vpop.xlane.xlu0 %368  ;;  %v612_v53 = vadd.f32 %v611_v30, %v509_v2  ;;  %v516_v9 = vmul.f32 %v2097_v42, %v2097_v42  ;;  %v515_v14 = vmul.f32 %v2094_v61, %v2094_v61  ;;  %v2609_v2 = vld [vmem:[#allocation5_spill] sm:$0xff] }
  0xd5   : > { %2603 = vst [vmem:[#allocation59_spill] sm:$0xff] %v2101_v40  ;;  %2605 = vst [vmem:[#allocation2_spill] sm:$0xff] %v2104_v46  ;;  %v404_v56 = vmul.f32 0.0051020407, %v369_v25  ;;  %v513_v18 = vmul.f32 %v2101_v40, %v2101_v40  ;;  %v514_v33 = vmul.f32 %v2104_v46, %v2104_v46 }
  0xd6   : > { %v2114_v58 = vsub.f32 %v1721_v57, %v405_v63  ;;  %v2117_v31 = vsub.f32 %v2607_v50, %v405_v63  ;;  %609 = vadd.xlane.f32.xlu0 %v608_v47  ;;  %613 = vadd.xlane.f32.xlu1 %v612_v53  ;;  %v623_v7 = vsel %vm261_vm0, %v516_v9, 0.0  ;;  %v2613_v9 = vld [vmem:[#allocation7_spill] sm:$0xff] }
  0xd7   : > { %v2122_v62 = vsub.f32 %v2609_v2, %v404_v56  ;;  %v2125_v34 = vsub.f32 %v2611_v52, %v404_v56  ;;  %v619_v55 = vsel %vm261_vm0, %v514_v33, 0.0  ;;  %v624_v56 = vadd.f32 %v623_v7, %v515_v14 }
  0xd8   : > { %2606 = vst [vmem:[#allocation60_spill] sm:$0xff] %v2114_v58  ;;  %2608 = vst [vmem:[#allocation3_spill] sm:$0xff] %v2117_v31  ;;  %v377_v57 = vpop.xlane.xlu0 %376  ;;  %v620_v30 = vadd.f32 %v619_v55, %v513_v18  ;;  %v520_v63 = vmul.f32 %v2117_v31, %v2117_v31  ;;  %v519_v33 = vmul.f32 %v2114_v58, %v2114_v58  ;;  %v2615_v18 = vld [vmem:[#allocation6_spill] sm:$0xff] }
  0xd9   : > { %2610 = vst [vmem:[#allocation5_spill] sm:$0xff] %v2122_v62  ;;  %2612 = vst [vmem:[#allocation4_spill] sm:$0xff] %v2125_v34  ;;  %v406_v47 = vmul.f32 0.0051020407, %v377_v57  ;;  %v517_v53 = vmul.f32 %v2122_v62, %v2122_v62  ;;  %v518_v25 = vmul.f32 %v2125_v34, %v2125_v34 }
  0xda   : > { %617 = vadd.xlane.f32.xlu0 %v616_v20  ;;  %621 = vadd.xlane.f32.xlu1 %v620_v30  ;;  %v631_v55 = vsel %vm261_vm0, %v520_v63, 0.0  ;;  %v2153_v63 = vpop.permute.xlu1 %965 }
  0xdb   : > { %v2138_v50 = vsub.f32 %v2613_v9, %v406_v47  ;;  %v2141_v2 = vsub.f32 %v2615_v18, %v406_v47  ;;  %v627_v52 = vsel %vm261_vm0, %v518_v25, 0.0  ;;  %v632_v7 = vadd.f32 %v631_v55, %v519_v33  ;;  %v2151_v25 = vld [vmem:[%s1745_s19 + $0xb0] sm:$0xff]  ;;  %v2160_v9 = vld [vmem:[%s1745_s19 + $0xa8] sm:$0xff]  ;;  %v2170_v18 = vld [vmem:[%s1745_s19 + $0xb8] sm:$0xff] }
  0xdc   : > { %v628_v57 = vadd.f32 %v627_v52, %v517_v53  ;;  %v2157_v53 = vld [vmem:[%s1745_s19 + $0xc0] sm:$0xff]  ;;  %v2177_v55 = vld [vmem:[%s1745_s19 + $0xc8] sm:$0xff] }
  0xdd   : > { %2614 = vst [vmem:[#allocation7_spill] sm:$0xff] %v2138_v50  ;;  %2616 = vst [vmem:[#allocation6_spill] sm:$0xff] %v2141_v2  ;;  %v521_v20 = vmul.f32 %v2138_v50, %v2138_v50  ;;  %v522_v14 = vmul.f32 %v2141_v2, %v2141_v2 }
  0xde   : > { %625 = vadd.xlane.f32.xlu0 %v624_v56  ;;  %629 = vadd.xlane.f32.xlu1 %v628_v57  ;;  %v2165_v56 = vld [vmem:[%s1745_s19 + $0xd0] sm:$0xff]  ;;  %v2167_v33 = vpop.permute.xlu1 %970 }
  0xdf   : > { %v635_v30 = vsel %vm261_vm0, %v522_v14, 0.0 }
  0xe0   : > { %v636_v47 = vadd.f32 %v635_v30, %v521_v20  ;;  %v2174_v52 = vpop.permute.xlu0 %960  ;;  %v1444_v20 = vmov 0  }
  0xe2   : > { %633 = vadd.xlane.f32.xlu0 %v632_v7  ;;  %637 = vadd.xlane.f32.xlu1 %v636_v47  ;;  %v2179_v57 = vpop.permute.xlu1 %980 }
  0xe4   : > { %v2182_v14 = vpop.permute.xlu0 %975 }
  0xe6   : > { %v2184_v7 = vpop.permute.xlu1 %990 }
  0xe8   : > { %v2186_v30 = vpop.permute.xlu0 %985 }
  0xea   : > { %v2188_v47 = vpop.permute.xlu1 %1000 }
  0xec   : > { %v2190_v2 = vpop.permute.xlu0 %995 }
  0xee   : > { %v2192_v50 = vpop.permute.xlu1 %1010 }
  0xef   : > { %2617 = vst [vmem:[#allocation61_spill] sm:$0xff] %v2192_v50 }
  0xf0   : > { %v2194_v34 = vpop.permute.xlu0 %1005 }
  0xf2   : > { %v2196_v62 = vpop.permute.xlu1 %1020 }
  0xf3   : > { %1070 = vperm.xlu1 %1372, %v2151_v25   ;;  %2618 = vst [vmem:[#allocation62_spill] sm:$0xff] %v2196_v62 }
  0xf4   : > { %v2198_v46 = vpop.permute.xlu0 %1015 }
  0xf6   : > { %v2200_v40 = vpop.permute.xlu1 %1030 }
  0xf7   : > { %1080 = vperm.xlu1 %1372, %v2157_v53   ;;  %2619 = vst [vmem:[#allocation63_spill] sm:$0xff] %v2200_v40 }
  0xf8   : > { %1065 = vperm.xlu0 %1371, %v2160_v9   ;;  %v2202_v17 = vpop.permute.xlu0 %1025 }
  0xfb   : > { %1090 = vperm.xlu1 %1372, %v2165_v56  }
  0xfc   : > { %1075 = vperm.xlu0 %1371, %v2170_v18   ;;  %v2206_v31 = vpop.permute.xlu0 %1035 }
  0xff   : > { %1374 = vset.pattern.permute.xlu1 %v1444_v20 }
 0x100   : > { %1085 = vperm.xlu0 %1371, %v2177_v55   ;;  %v2210_v39 = vpop.permute.xlu0 %1045 }
 0x101   : > { %2622 = vst [vmem:[#allocation66_spill] sm:$0xff] %v2210_v39 }
 0x104   : > { %1373 = vset.pattern.permute.xlu0 %v1444_v20  ;;  %v2204_v20 = vpop.permute.xlu1 %1040  ;;  %v2214_v42 = vpop.permute.xlu0 %1055 }
 0x105   : > { %2620 = vst [vmem:[#allocation64_spill] sm:$0xff] %v2204_v20  ;;  %2624 = vst [vmem:[#allocation68_spill] sm:$0xff] %v2214_v42 }
 0x108   : > { %v2208_v58 = vpop.permute.xlu1 %1050 }
 0x109   : > { %2621 = vst [vmem:[#allocation65_spill] sm:$0xff] %v2208_v58 }
 0x10c   : > { %v2212_v24 = vpop.permute.xlu1 %1060 }
 0x10d   : > { %2623 = vst [vmem:[#allocation67_spill] sm:$0xff] %v2212_v24 }
 0x133   : > { %v526_v61 = vpop.xlane.xlu1 %525 }
 0x134   : > { %v639_v37 = vmul.f32 0.0051020407, %v526_v61 }
 0x136   : > { %v668_v35 = vadd.f32 1e-05, %v639_v37 }
 0x137   : > { %v534_v26 = vpop.xlane.xlu1 %533  ;;  %v530_v36 = vpop.xlane.xlu0 %529 }
 0x138   : > { %1377 = vrsqrt.f32 %v668_v35  ;;  %v641_v23 = vmul.f32 0.0051020407, %v534_v26  ;;  %v640_v11 = vmul.f32 0.0051020407, %v530_v36  ;;  %v2625_v35 = vld [vmem:[#allocation11_spill] sm:$0xff] }
 0x13a   : > { %v669_v40 = vadd.f32 1e-05, %v640_v11  ;;  %v670_v20 = vadd.f32 1e-05, %v641_v23 }
 0x13b   : > { %v542_v10 = vpop.xlane.xlu1 %541  ;;  %v538_v45 = vpop.xlane.xlu0 %537 }
 0x13c   : > { %v642_v15 = vmul.f32 0.0051020407, %v538_v45  ;;  %1379 = vrsqrt.f32 %v669_v40  ;;  %v643_v58 = vmul.f32 0.0051020407, %v542_v10 }
 0x13d   : > { %1381 = vrsqrt.f32 %v670_v20 }
 0x13e   : > { %v671_v5 = vadd.f32 1e-05, %v642_v15  ;;  %v672_v42 = vadd.f32 1e-05, %v643_v58 }
 0x13f   : > { %v550_v24 = vpop.xlane.xlu1 %549  ;;  %v546_v62 = vpop.xlane.xlu0 %545 }
 0x140   : > { %1383 = vrsqrt.f32 %v671_v5  ;;  %v644_v61 = vmul.f32 0.0051020407, %v546_v62  ;;  %v645_v11 = vmul.f32 0.0051020407, %v550_v24  ;;  %v2626_v62 = vld [vmem:[#allocation8_spill] sm:$0xff] }
 0x141   : > { %1385 = vrsqrt.f32 %v672_v42 }
 0x142   : > { %v673_v23 = vadd.f32 1e-05, %v644_v61  ;;  %v674_v15 = vadd.f32 1e-05, %v645_v11 }
 0x143   : > { %v558_v37 = vpop.xlane.xlu1 %557  ;;  %v554_v59 = vpop.xlane.xlu0 %553 }
 0x144   : > { %1387 = vrsqrt.f32 %v673_v23  ;;  %v646_v20 = vmul.f32 0.0051020407, %v554_v59  ;;  %v647_v24 = vmul.f32 0.0051020407, %v558_v37 }
 0x145   : > { %v1378_v4 = vpop.eup %1377 }
 0x146   : > { %v726_v26 = vmul.f32 %v1378_v4, %v2625_v35  ;;  %v675_v42 = vadd.f32 1e-05, %v646_v20  ;;  %v2627_v35 = vld [vmem:[#allocation9_spill] sm:$0xff]  ;;  %v676_v51 = vadd.f32 1e-05, %v647_v24 }
 0x147   : > { %v566_v36 = vpop.xlane.xlu1 %565  ;;  %v562_v41 = vpop.xlane.xlu0 %561 }
 0x148   : > { %v648_v45 = vmul.f32 0.0051020407, %v562_v41  ;;  %757 = vperm.xlu0 %1373, %v726_v26   ;;  %v649_v59 = vmul.f32 0.0051020407, %v566_v36 }
 0x149   : > { %v1380_v40 = vpop.eup %1379 }
 0x14a   : > { %v677_v10 = vadd.f32 1e-05, %v648_v45  ;;  %v727_v60 = vmul.f32 %v1380_v40, %v2626_v62  ;;  %v1382_v39 = vpop.eup %1381  ;;  %v678_v37 = vadd.f32 1e-05, %v649_v59  ;;  %v2631_v59 = vld [vmem:[#allocation19_spill] sm:$0xff] }
 0x14b   : > { %v574_v58 = vpop.xlane.xlu1 %573  ;;  %v570_v5 = vpop.xlane.xlu0 %569  ;;  %v728_v26 = vmul.f32 %v1382_v39, %v2627_v35 }
 0x14c   : > { %v650_v50 = vmul.f32 0.0051020407, %v570_v5  ;;  %1389 = vrsqrt.f32 %v677_v10  ;;  %762 = vperm.xlu1 %1374, %v727_v60   ;;  %v2628_v10 = vld [vmem:[#allocation13_spill] sm:$0xff]  ;;  %v651_v20 = vmul.f32 0.0051020407, %v574_v58 }
 0x14d   : > { %1391 = vrsqrt.f32 %v674_v15  ;;  %v1384_v45 = vpop.eup %1383 }
 0x14e   : > { %v679_v4 = vadd.f32 1e-05, %v650_v50  ;;  %v729_v60 = vmul.f32 %v1384_v45, %v2628_v10  ;;  %v1386_v50 = vpop.eup %1385 }
 0x14f   : > { %v582_v61 = vpop.xlane.xlu1 %581  ;;  %v578_v41 = vpop.xlane.xlu0 %577 }
 0x150   : > { %v652_v11 = vmul.f32 0.0051020407, %v578_v41  ;;  %1393 = vrsqrt.f32 %v679_v4  ;;  %767 = vperm.xlu1 %1374, %v728_v26   ;;  %v2629_v41 = vld [vmem:[#allocation10_spill] sm:$0xff]  ;;  %v653_v45 = vmul.f32 0.0051020407, %v582_v61 }
 0x151   : > { %1395 = vrsqrt.f32 %v675_v42  ;;  %v730_v4 = vmul.f32 %v1386_v50, %v2629_v41  ;;  %v1388_v35 = vpop.eup %1387  ;;  %v680_v42 = vadd.f32 1e-05, %v651_v20  ;;  %v2632_v20 = vld [vmem:[#allocation12_spill] sm:$0xff] }
 0x152   : > { %v681_v23 = vadd.f32 1e-05, %v652_v11 }
 0x153   : > { %v590_v40 = vpop.xlane.xlu1 %589  ;;  %v586_v5 = vpop.xlane.xlu0 %585 }
 0x154   : > { %v654_v15 = vmul.f32 0.0051020407, %v586_v5  ;;  %1397 = vrsqrt.f32 %v681_v23  ;;  %772 = vperm.xlu1 %1374, %v729_v60   ;;  %v2630_v23 = vld [vmem:[#allocation15_spill] sm:$0xff] }
 0x155   : > { %1399 = vrsqrt.f32 %v676_v51  ;;  %v731_v10 = vmul.f32 %v1388_v35, %v2630_v23 }
 0x156   : > { %v683_v62 = vadd.f32 1e-05, %v654_v15  ;;  %v682_v15 = vadd.f32 1e-05, %v653_v45  ;;  %v2634_v45 = vld [vmem:[#allocation17_spill] sm:$0xff] }
 0x157   : > { %v594_v39 = vpop.xlane.xlu0 %593  ;;  %v598_v36 = vpop.xlane.xlu1 %597 }
 0x158   : > { %v656_v26 = vmul.f32 0.0051020407, %v594_v39  ;;  %1401 = vrsqrt.f32 %v683_v62  ;;  %777 = vperm.xlu1 %1374, %v730_v4   ;;  %v655_v62 = vmul.f32 0.0051020407, %v590_v40  ;;  %v2633_v4 = vld [vmem:[#allocation21_spill] sm:$0xff] }
 0x159   : > { %v1390_v24 = vpop.eup %1389  ;;  %1403 = vrsqrt.f32 %v678_v37  ;;  %v657_v23 = vmul.f32 0.0051020407, %v598_v36 }
 0x15a   : > { %v685_v11 = vadd.f32 1e-05, %v656_v26  ;;  %v735_v58 = vmul.f32 %v1390_v24, %v2631_v59  ;;  %v1392_v60 = vpop.eup %1391 }
 0x15b   : > { %v602_v5 = vpop.xlane.xlu0 %601  ;;  %v606_v39 = vpop.xlane.xlu1 %605  ;;  %v732_v61 = vmul.f32 %v1392_v60, %v2632_v20  ;;  %v686_v20 = vadd.f32 1e-05, %v657_v23 }
 0x15c   : > { %v658_v51 = vmul.f32 0.0051020407, %v602_v5  ;;  %1405 = vrsqrt.f32 %v685_v11  ;;  %782 = vperm.xlu1 %1374, %v731_v10   ;;  %802 = vperm.xlu0 %1373, %v735_v58   ;;  %v684_v11 = vadd.f32 1e-05, %v655_v62  ;;  %v2635_v10 = vld [vmem:[#allocation23_spill] sm:$0xff] }
 0x15d   : > { %v1394_v50 = vpop.eup %1393  ;;  %1407 = vrsqrt.f32 %v680_v42 }
 0x15e   : > { %v687_v41 = vadd.f32 1e-05, %v658_v51  ;;  %v737_v26 = vmul.f32 %v1394_v50, %v2633_v4  ;;  %v1396_v29 = vpop.eup %1395  ;;  %v2637_v4 = vld [vmem:[#allocation25_spill] sm:$0xff] }
 0x15f   : > { %v610_v37 = vpop.xlane.xlu0 %609  ;;  %v733_v40 = vmul.f32 %v1396_v29, %v2634_v45  ;;  %v614_v51 = vpop.xlane.xlu1 %613 }
 0x160   : > { %v660_v35 = vmul.f32 0.0051020407, %v610_v37  ;;  %1409 = vrsqrt.f32 %v687_v41  ;;  %787 = vperm.xlu1 %1374, %v732_v61   ;;  %812 = vperm.xlu0 %1373, %v737_v26   ;;  %v2636_v61 = vld [vmem:[#allocation14_spill] sm:$0xff] }
 0x161   : > { %v1398_v24 = vpop.eup %1397  ;;  %1411 = vrsqrt.f32 %v682_v15  ;;  %v659_v15 = vmul.f32 0.0051020407, %v606_v39  ;;  %v2639_v39 = vld [vmem:[#allocation27_spill] sm:$0xff] }
 0x162   : > { %v689_v5 = vadd.f32 1e-05, %v660_v35  ;;  %v739_v59 = vmul.f32 %v1398_v24, %v2635_v10  ;;  %v1400_v58 = vpop.eup %1399  ;;  %v661_v10 = vmul.f32 0.0051020407, %v614_v51 }
 0x163   : > { %v618_v42 = vpop.xlane.xlu0 %617  ;;  %v734_v36 = vmul.f32 %v1400_v58, %v2636_v61  ;;  %v622_v24 = vpop.xlane.xlu1 %621 }
 0x164   : > { %v662_v60 = vmul.f32 0.0051020407, %v618_v42  ;;  %1413 = vrsqrt.f32 %v689_v5  ;;  %792 = vperm.xlu1 %1374, %v733_v40   ;;  %822 = vperm.xlu0 %1373, %v739_v59   ;;  %v2638_v42 = vld [vmem:[#allocation16_spill] sm:$0xff] }
 0x165   : > { %v1402_v50 = vpop.eup %1401  ;;  %1415 = vrsqrt.f32 %v684_v11  ;;  %v688_v11 = vadd.f32 1e-05, %v659_v15  ;;  %v2642_v15 = vld [vmem:[#allocation20_spill] sm:$0xff] }
 0x166   : > { %v691_v41 = vadd.f32 1e-05, %v662_v60  ;;  %v1404_v37 = vpop.eup %1403  ;;  %v741_v26 = vmul.f32 %v1402_v50, %v2637_v4  ;;  %v663_v4 = vmul.f32 0.0051020407, %v622_v24 }
 0x167   : > { %v626_v62 = vpop.xlane.xlu0 %625  ;;  %v736_v45 = vmul.f32 %v1404_v37, %v2638_v42  ;;  %v2641_v37 = vld [vmem:[#allocation28_spill] sm:$0xff] }
 0x168   : > { %v664_v29 = vmul.f32 0.0051020407, %v626_v62  ;;  %1417 = vrsqrt.f32 %v691_v41  ;;  %797 = vperm.xlu1 %1374, %v734_v36   ;;  %832 = vperm.xlu0 %1373, %v741_v26   ;;  %v2640_v41 = vld [vmem:[#allocation18_spill] sm:$0xff]  ;;  %v690_v36 = vadd.f32 1e-05, %v661_v10 }
 0x169   : > { %v1406_v35 = vpop.eup %1405  ;;  %1419 = vrsqrt.f32 %v686_v20  ;;  %v630_v20 = vpop.xlane.xlu1 %629 }
 0x16a   : > { %v693_v5 = vadd.f32 1e-05, %v664_v29  ;;  %v1408_v40 = vpop.eup %1407  ;;  %v743_v59 = vmul.f32 %v1406_v35, %v2639_v39  ;;  %v665_v42 = vmul.f32 0.0051020407, %v630_v20 }
 0x16b   : > { %v634_v23 = vpop.xlane.xlu0 %633  ;;  %v738_v62 = vmul.f32 %v1408_v40, %v2640_v41  ;;  %v2644_v41 = vld [vmem:[#allocation24_spill] sm:$0xff] }
 0x16c   : > { %v666_v60 = vmul.f32 0.0051020407, %v634_v23  ;;  %1421 = vrsqrt.f32 %v693_v5  ;;  %807 = vperm.xlu1 %1374, %v736_v45   ;;  %842 = vperm.xlu0 %1373, %v743_v59   ;;  %v692_v5 = vadd.f32 1e-05, %v663_v4  ;;  %v694_v23 = vadd.f32 1e-05, %v665_v42 }
 0x16d   : > { %v1410_v58 = vpop.eup %1409  ;;  %1423 = vrsqrt.f32 %v688_v11  ;;  %v638_v24 = vpop.xlane.xlu1 %637  ;;  %v2643_v11 = vld [vmem:[#allocation22_spill] sm:$0xff] }
 0x16e   : > { %v695_v50 = vadd.f32 1e-05, %v666_v60  ;;  %v1412_v61 = vpop.eup %1411  ;;  %v745_v26 = vmul.f32 %v1410_v58, %v2641_v37  ;;  %v667_v39 = vmul.f32 0.0051020407, %v638_v24  ;;  %v2645_v37 = vld [vmem:[#allocation26_spill] sm:$0xff] }
 0x16f   : > { %v740_v29 = vmul.f32 %v1412_v61, %v2642_v15 }
 0x170   : > { %1425 = vrsqrt.f32 %v695_v50  ;;  %817 = vperm.xlu1 %1374, %v738_v62   ;;  %852 = vperm.xlu0 %1373, %v745_v26   ;;  %v696_v50 = vadd.f32 1e-05, %v667_v39  ;;  %v2647_v39 = vld [vmem:[#allocation31_spill] sm:$0xff] }
 0x171   : > { %v1414_v51 = vpop.eup %1413  ;;  %1427 = vrsqrt.f32 %v690_v36  ;;  %v259_v36 = vld [vmem:[%s1745_s19 + $0xd8] sm:$0xff]  ;;  %v2249_v24 = vpop.permute.xlu1 %1070 }
 0x172   : > { %v1416_v35 = vpop.eup %1415  ;;  %v747_v45 = vmul.f32 %v1414_v51, %v2160_v9  ;;  %1429 = vrsqrt.f32 %v692_v5 }
 0x173   : > { %v742_v10 = vmul.f32 %v1416_v35, %v2643_v11  ;;  %1431 = vrsqrt.f32 %v694_v23 }
 0x174   : > { %827 = vperm.xlu1 %1374, %v740_v29   ;;  %862 = vperm.xlu0 %1373, %v747_v45   ;;  %1433 = vrsqrt.f32 %v696_v50  ;;  %v2646_v29 = vmov 1   ;;  %v260_v45 = vld [vmem:[%s1745_s19 + $0xe0] sm:$0xff] }
 0x175   : > { %v1418_v40 = vpop.eup %1417 }
 0x176   : > { %v749_v59 = vmul.f32 %v1418_v40, %v2170_v18  ;;  %v1420_v60 = vpop.eup %1419 }
 0x177   : > { %v744_v9 = vmul.f32 %v1420_v60, %v2644_v41  ;;  %v2648_v60 = vld [vmem:[#allocation32_spill] sm:$0xff] }
 0x178   : > { %837 = vperm.xlu1 %1374, %v742_v10   ;;  %872 = vperm.xlu0 %1373, %v749_v59  }
 0x179   : > { %v1422_v58 = vpop.eup %1421 }
 0x17a   : > { %v751_v62 = vmul.f32 %v1422_v58, %v2177_v55  ;;  %v1424_v61 = vpop.eup %1423 }
 0x17b   : > { %v746_v26 = vmul.f32 %v1424_v61, %v2645_v37 }
 0x17c   : > { %847 = vperm.xlu1 %1374, %v744_v9   ;;  %882 = vperm.xlu0 %1373, %v751_v62  }
 0x17d   : > { %v1426_v4 = vpop.eup %1425 }
 0x17e   : > { %v753_v18 = vmul.f32 %v1426_v4, %v259_v36  ;;  %v1428_v20 = vpop.eup %1427  ;;  %v2649_v4 = vld [vmem:[#allocation35_spill] sm:$0xff] }
 0x17f   : > { %v748_v51 = vmul.f32 %v1428_v20, %v2151_v25  ;;  %v1430_v15 = vpop.eup %1429  ;;  %v2247_v25 = vpop.permute.xlu0 %1065 }
 0x180   : > { %857 = vperm.xlu1 %1374, %v746_v26   ;;  %892 = vperm.xlu0 %1373, %v753_v18   ;;  %v750_v55 = vmul.f32 %v1430_v15, %v2157_v53  ;;  %v1432_v35 = vpop.eup %1431  ;;  %v2253_v53 = vpop.permute.xlu1 %1080  ;;  %v2650_v15 = vld [vmem:[#allocation29_spill] sm:$0xff] }
 0x181   : > { %v752_v5 = vmul.f32 %v1432_v35, %v2165_v56  ;;  %v1434_v42 = vpop.eup %1433 }
 0x182   : > { %v754_v40 = vmul.f32 %v1434_v42, %v260_v45 }
 0x183   : > { %v2251_v11 = vpop.permute.xlu0 %1075 }
 0x184   : > { %867 = vperm.xlu1 %1374, %v748_v51   ;;  %1375 = vset.pattern.permute.xlu0 %v2646_v29  ;;  %v2257_v23 = vpop.permute.xlu1 %1090 }
 0x185   : > { %1095 = vperm.xlu0 %1375, %v259_v36  }
 0x187   : > { %v2255_v10 = vpop.permute.xlu0 %1085 }
 0x188   : > { %877 = vperm.xlu1 %1374, %v750_v55   ;;  %v2651_v55 = vld [vmem:[#allocation30_spill] sm:$0xff] }
 0x18c   : > { %887 = vperm.xlu1 %1374, %v752_v5  }
 0x190   : > { %897 = vperm.xlu1 %1374, %v754_v40   ;;  %v2652_v40 = vld [vmem:[#allocation33_spill] sm:$0xff] }
 0x194   : > { %1376 = vset.pattern.permute.xlu1 %v2646_v29 }
 0x195   : > { %1100 = vperm.xlu1 %1376, %v260_v45  }
 0x1c3   : > { %v758_v56 = vpop.permute.xlu0 %757 }
 0x1c4   : > { %v900_v59 = vmul.f32 %v758_v56, %v2647_v39  ;;  %v901_v58 = vmul.f32 %v758_v56, %v2648_v60  ;;  %v2653_v39 = vld [vmem:[#allocation34_spill] sm:$0xff] }
 0x1c6   : > { %v1103_v50 = vadd.f32 %v2174_v52, %v900_v59  ;;  %v1104_v41 = vadd.f32 %v2174_v52, %v901_v58 }
 0x1c7   : > { %v763_v61 = vpop.permute.xlu1 %762 }
 0x1c8   : > { %v1161_v9 = vmax.f32 %v1103_v50, 0.0  ;;  %v1162_v62 = vmax.f32 %v1104_v41, 0.0  ;;  %v902_v36 = vmul.f32 %v763_v61, %v1858_v13  ;;  %v903_v37 = vmul.f32 %v763_v61, %v2649_v4 }
 0x1ca   : > { %1219 = vst [vmem:[%s2268_s22] sm:$0xff] %v1161_v9  ;;  %1220 = vst.msk [vmem:[%s2268_s22 + $0x8] sm:$0xff] %vm261_vm0, %v1162_v62  ;;  %v1105_v52 = vadd.f32 %v2153_v63, %v902_v36  ;;  %v1106_v26 = vadd.f32 %v2153_v63, %v903_v37 }
 0x1cb   : > { %v768_v18 = vpop.permute.xlu1 %767 }
 0x1cc   : > { %v1163_v20 = vmax.f32 %v1105_v52, 0.0  ;;  %v1164_v51 = vmax.f32 %v1106_v26, 0.0  ;;  %v904_v29 = vmul.f32 %v768_v18, %v2650_v15  ;;  %v905_v35 = vmul.f32 %v768_v18, %v2651_v55 }
 0x1ce   : > { %1221 = vst [vmem:[%s2268_s22 + $0x10] sm:$0xff] %v1163_v20  ;;  %1222 = vst.msk [vmem:[%s2268_s22 + $0x18] sm:$0xff] %vm261_vm0, %v1164_v51  ;;  %v1107_v13 = vadd.f32 %v2167_v33, %v904_v29  ;;  %v1108_v5 = vadd.f32 %v2167_v33, %v905_v35 }
 0x1cf   : > { %v773_v42 = vpop.permute.xlu1 %772 }
 0x1d0   : > { %v1165_v45 = vmax.f32 %v1107_v13, 0.0  ;;  %v1166_v63 = vmax.f32 %v1108_v5, 0.0  ;;  %v906_v56 = vmul.f32 %v773_v42, %v2652_v40  ;;  %v907_v59 = vmul.f32 %v773_v42, %v2653_v39 }
 0x1d2   : > { %1223 = vst [vmem:[%s2268_s22 + $0x20] sm:$0xff] %v1165_v45  ;;  %1224 = vst.msk [vmem:[%s2268_s22 + $0x28] sm:$0xff] %vm261_vm0, %v1166_v63  ;;  %v1109_v60 = vadd.f32 %v2182_v14, %v906_v56  ;;  %v1110_v58 = vadd.f32 %v2182_v14, %v907_v59  ;;  %v2654_v56 = vld [vmem:[#allocation36_spill] sm:$0xff] }
 0x1d3   : > { %v778_v50 = vpop.permute.xlu1 %777 }
 0x1d4   : > { %v1167_v41 = vmax.f32 %v1109_v60, 0.0  ;;  %v1168_v9 = vmax.f32 %v1110_v58, 0.0  ;;  %v908_v33 = vmul.f32 %v778_v50, %v1881_v54  ;;  %v909_v62 = vmul.f32 %v778_v50, %v1884_v22 }
 0x1d6   : > { %1225 = vst [vmem:[%s2268_s22 + $0x30] sm:$0xff] %v1167_v41  ;;  %1226 = vst.msk [vmem:[%s2268_s22 + $0x38] sm:$0xff] %vm261_vm0, %v1168_v9  ;;  %v1111_v61 = vadd.f32 %v2179_v57, %v908_v33  ;;  %v1112_v36 = vadd.f32 %v2179_v57, %v909_v62 }
 0x1d7   : > { %v783_v4 = vpop.permute.xlu1 %782  ;;  %v803_v37 = vpop.permute.xlu0 %802 }
 0x1d8   : > { %v1169_v52 = vmax.f32 %v1111_v61, 0.0  ;;  %v1170_v14 = vmax.f32 %v1112_v36, 0.0  ;;  %v910_v26 = vmul.f32 %v783_v4, %v1874_v38  ;;  %v911_v18 = vmul.f32 %v783_v4, %v1877_v49 }
 0x1d9   : > { %v918_v20 = vmul.f32 %v803_v37, %v1918_v6  ;;  %v919_v54 = vmul.f32 %v803_v37, %v1921_v19 }
 0x1da   : > { %1227 = vst [vmem:[%s2268_s22 + $0x40] sm:$0xff] %v1169_v52  ;;  %1228 = vst.msk [vmem:[%s2268_s22 + $0x48] sm:$0xff] %vm261_vm0, %v1170_v14  ;;  %v1113_v22 = vadd.f32 %v2186_v30, %v910_v26  ;;  %v1114_v57 = vadd.f32 %v2186_v30, %v911_v18 }
 0x1db   : > { %v1121_v51 = vadd.f32 %v2194_v34, %v918_v20  ;;  %v1122_v38 = vadd.f32 %v2194_v34, %v919_v54  ;;  %v788_v49 = vpop.permute.xlu1 %787  ;;  %v813_v15 = vpop.permute.xlu0 %812 }
 0x1dc   : > { %v1171_v6 = vmax.f32 %v1113_v22, 0.0  ;;  %v1172_v29 = vmax.f32 %v1114_v57, 0.0  ;;  %v912_v19 = vmul.f32 %v788_v49, %v1902_v3  ;;  %v913_v55 = vmul.f32 %v788_v49, %v1905_v8  ;;  %v2655_v22 = vld [vmem:[#allocation41_spill] sm:$0xff] }
 0x1dd   : > { %v1179_v35 = vmax.f32 %v1121_v51, 0.0  ;;  %v1180_v13 = vmax.f32 %v1122_v38, 0.0  ;;  %v922_v5 = vmul.f32 %v813_v15, %v1938_v32  ;;  %v923_v30 = vmul.f32 %v813_v15, %v1941_v27  ;;  %v2656_v51 = vld [vmem:[#allocation42_spill] sm:$0xff]  ;;  %v2657_v49 = vld [vmem:[#allocation61_spill] sm:$0xff] }
 0x1de   : > { %1229 = vst [vmem:[%s2268_s22 + $0x50] sm:$0xff] %v1171_v6  ;;  %1230 = vst.msk [vmem:[%s2268_s22 + $0x58] sm:$0xff] %vm261_vm0, %v1172_v29  ;;  %v1115_v34 = vadd.f32 %v2184_v7, %v912_v19  ;;  %v1116_v42 = vadd.f32 %v2184_v7, %v913_v55 }
 0x1df   : > { %1237 = vst [vmem:[%s2268_s22 + $0x90] sm:$0xff] %v1179_v35  ;;  %1238 = vst.msk [vmem:[%s2268_s22 + $0x98] sm:$0xff] %vm261_vm0, %v1180_v13  ;;  %v1125_v3 = vadd.f32 %v2198_v46, %v922_v5  ;;  %v1126_v8 = vadd.f32 %v2198_v46, %v923_v30  ;;  %v793_v32 = vpop.permute.xlu1 %792  ;;  %v823_v27 = vpop.permute.xlu0 %822  ;;  %v2659_v13 = vld [vmem:[#allocation37_spill] sm:$0xff]  ;;  %v2660_v30 = vld [vmem:[#allocation38_spill] sm:$0xff] }
 0x1e0   : > { %v1173_v45 = vmax.f32 %v1115_v34, 0.0  ;;  %v1174_v63 = vmax.f32 %v1116_v42, 0.0  ;;  %v914_v40 = vmul.f32 %v793_v32, %v1894_v16  ;;  %v915_v39 = vmul.f32 %v793_v32, %v2654_v56 }
 0x1e1   : > { %v1183_v59 = vmax.f32 %v1125_v3, 0.0  ;;  %v1184_v7 = vmax.f32 %v1126_v8, 0.0  ;;  %v926_v60 = vmul.f32 %v823_v27, %v1962_v44  ;;  %v927_v58 = vmul.f32 %v823_v27, %v1965_v12  ;;  %v2661_v8 = vld [vmem:[#allocation45_spill] sm:$0xff]  ;;  %v2662_v27 = vld [vmem:[#allocation46_spill] sm:$0xff] }
 0x1e2   : > { %1231 = vst [vmem:[%s2268_s22 + $0x60] sm:$0xff] %v1173_v45  ;;  %1232 = vst.msk [vmem:[%s2268_s22 + $0x68] sm:$0xff] %vm261_vm0, %v1174_v63  ;;  %v1117_v46 = vadd.f32 %v2190_v2, %v914_v40  ;;  %v1118_v50 = vadd.f32 %v2190_v2, %v915_v39  ;;  %v2663_v63 = vld [vmem:[#allocation62_spill] sm:$0xff]  ;;  %v2664_v39 = vld [vmem:[#allocation68_spill] sm:$0xff] }
 0x1e3   : > { %1241 = vst [vmem:[%s2268_s22 + $0xb0] sm:$0xff] %v1183_v59  ;;  %1242 = vst.msk [vmem:[%s2268_s22 + $0xb8] sm:$0xff] %vm261_vm0, %v1184_v7  ;;  %v1129_v16 = vadd.f32 %v2202_v17, %v926_v60  ;;  %v1130_v41 = vadd.f32 %v2202_v17, %v927_v58  ;;  %v798_v44 = vpop.permute.xlu1 %797  ;;  %v833_v12 = vpop.permute.xlu0 %832 }
 0x1e4   : > { %v1175_v9 = vmax.f32 %v1117_v46, 0.0  ;;  %v1176_v33 = vmax.f32 %v1118_v50, 0.0  ;;  %v916_v62 = vmul.f32 %v798_v44, %v1925_v28  ;;  %v917_v61 = vmul.f32 %v798_v44, %v1928_v21  ;;  %v2666_v44 = vld [vmem:[#allocation40_spill] sm:$0xff] }
 0x1e5   : > { %v1187_v36 = vmax.f32 %v1129_v16, 0.0  ;;  %v1188_v2 = vmax.f32 %v1130_v41, 0.0  ;;  %v930_v4 = vmul.f32 %v833_v12, %v1982_v48  ;;  %v931_v37 = vmul.f32 %v833_v12, %v1985_v43  ;;  %v2665_v16 = vld [vmem:[#allocation39_spill] sm:$0xff] }
 0x1e6   : > { %1233 = vst [vmem:[%s2268_s22 + $0x70] sm:$0xff] %v1175_v9  ;;  %1234 = vst.msk [vmem:[%s2268_s22 + $0x78] sm:$0xff] %vm261_vm0, %v1176_v33  ;;  %v1119_v17 = vadd.f32 %v2188_v47, %v916_v62  ;;  %v1120_v52 = vadd.f32 %v2188_v47, %v917_v61  ;;  %v2667_v62 = vld [vmem:[#allocation49_spill] sm:$0xff] }
 0x1e7   : > { %1245 = vst [vmem:[%s2268_s22 + $0xd0] sm:$0xff] %v1187_v36  ;;  %1246 = vst.msk [vmem:[%s2268_s22 + $0xd8] sm:$0xff] %vm261_vm0, %v1188_v2  ;;  %v1133_v28 = vadd.f32 %v2206_v31, %v930_v4  ;;  %v1134_v21 = vadd.f32 %v2206_v31, %v931_v37  ;;  %v808_v48 = vpop.permute.xlu1 %807  ;;  %v843_v43 = vpop.permute.xlu0 %842  ;;  %v2668_v36 = vld [vmem:[#allocation50_spill] sm:$0xff]  ;;  %v2669_v4 = vld [vmem:[#allocation63_spill] sm:$0xff] }
 0x1e8   : > { %v1177_v14 = vmax.f32 %v1119_v17, 0.0  ;;  %v1178_v26 = vmax.f32 %v1120_v52, 0.0  ;;  %v920_v18 = vmul.f32 %v808_v48, %v1946_v0  ;;  %v921_v20 = vmul.f32 %v808_v48, %v1949_v1  ;;  %v2658_v0 = vld [vmem:[#allocation66_spill] sm:$0xff] }
 0x1e9   : > { %v1191_v54 = vmax.f32 %v1133_v28, 0.0  ;;  %v1192_v47 = vmax.f32 %v1134_v21, 0.0  ;;  %v934_v57 = vmul.f32 %v843_v43, %v2655_v22  ;;  %v935_v38 = vmul.f32 %v843_v43, %v2656_v51 }
 0x1ea   : > { %1235 = vst [vmem:[%s2268_s22 + $0x80] sm:$0xff] %v1177_v14  ;;  %1236 = vst.msk [vmem:[%s2268_s22 + $0x88] sm:$0xff] %vm261_vm0, %v1178_v26  ;;  %v1123_v31 = vadd.f32 %v2657_v49, %v920_v18  ;;  %v1124_v15 = vadd.f32 %v2657_v49, %v921_v20  ;;  %v2670_v26 = vld [vmem:[#allocation43_spill] sm:$0xff]  ;;  %v2671_v20 = vld [vmem:[#allocation44_spill] sm:$0xff] }
 0x1eb   : > { %1249 = vst [vmem:[%s2268_s22 + $0xf0] sm:$0xff] %v1191_v54  ;;  %1250 = vst.msk [vmem:[%s2268_s22 + $0xf8] sm:$0xff] %vm261_vm0, %v1192_v47  ;;  %v1137_v1 = vadd.f32 %v2658_v0, %v934_v57  ;;  %v1138_v6 = vadd.f32 %v2658_v0, %v935_v38  ;;  %v818_v29 = vpop.permute.xlu1 %817  ;;  %v853_v19 = vpop.permute.xlu0 %852  ;;  %v2672_v57 = vld [vmem:[#allocation53_spill] sm:$0xff]  ;;  %v2673_v38 = vld [vmem:[#allocation54_spill] sm:$0xff] }
 0x1ec   : > { %v1181_v55 = vmax.f32 %v1123_v31, 0.0  ;;  %v1182_v35 = vmax.f32 %v1124_v15, 0.0  ;;  %v924_v5 = vmul.f32 %v818_v29, %v2659_v13  ;;  %v925_v34 = vmul.f32 %v818_v29, %v2660_v30  ;;  %v2674_v31 = vld [vmem:[#allocation64_spill] sm:$0xff] }
 0x1ed   : > { %v1195_v42 = vmax.f32 %v1137_v1, 0.0  ;;  %v1196_v3 = vmax.f32 %v1138_v6, 0.0  ;;  %v938_v32 = vmul.f32 %v853_v19, %v2661_v8  ;;  %v939_v45 = vmul.f32 %v853_v19, %v2662_v27 }
 0x1ee   : > { %1239 = vst [vmem:[%s2268_s22 + $0xa0] sm:$0xff] %v1181_v55  ;;  %1240 = vst.msk [vmem:[%s2268_s22 + $0xa8] sm:$0xff] %vm261_vm0, %v1182_v35  ;;  %v1127_v40 = vadd.f32 %v2663_v63, %v924_v5  ;;  %v1128_v56 = vadd.f32 %v2663_v63, %v925_v34  ;;  %v2675_v35 = vld [vmem:[#allocation47_spill] sm:$0xff]  ;;  %v2676_v5 = vld [vmem:[#allocation48_spill] sm:$0xff] }
 0x1ef   : > { %1253 = vst [vmem:[%s2268_s22 + $0x110] sm:$0xff] %v1195_v42  ;;  %1254 = vst.msk [vmem:[%s2268_s22 + $0x118] sm:$0xff] %vm261_vm0, %v1196_v3  ;;  %v1141_v59 = vadd.f32 %v2664_v39, %v938_v32  ;;  %v1142_v7 = vadd.f32 %v2664_v39, %v939_v45  ;;  %v828_v60 = vpop.permute.xlu1 %827  ;;  %v863_v58 = vpop.permute.xlu0 %862  ;;  %v2677_v3 = vld [vmem:[#allocation57_spill] sm:$0xff]  ;;  %v2678_v32 = vld [vmem:[#allocation58_spill] sm:$0xff] }
 0x1f0   : > { %v1185_v46 = vmax.f32 %v1127_v40, 0.0  ;;  %v1186_v50 = vmax.f32 %v1128_v56, 0.0  ;;  %v928_v41 = vmul.f32 %v828_v60, %v2665_v16  ;;  %v929_v12 = vmul.f32 %v828_v60, %v2666_v44 }
 0x1f1   : > { %v1199_v9 = vmax.f32 %v1141_v59, 0.0  ;;  %v1200_v33 = vmax.f32 %v1142_v7, 0.0  ;;  %v942_v61 = vmul.f32 %v863_v58, %v2667_v62  ;;  %v943_v2 = vmul.f32 %v863_v58, %v2668_v36  ;;  %v2680_v58 = vld [vmem:[#allocation51_spill] sm:$0xff] }
 0x1f2   : > { %1243 = vst [vmem:[%s2268_s22 + $0xc0] sm:$0xff] %v1185_v46  ;;  %1244 = vst.msk [vmem:[%s2268_s22 + $0xc8] sm:$0xff] %vm261_vm0, %v1186_v50  ;;  %v1131_v37 = vadd.f32 %v2669_v4, %v928_v41  ;;  %v1132_v17 = vadd.f32 %v2669_v4, %v929_v12  ;;  %v2681_v50 = vld [vmem:[#allocation52_spill] sm:$0xff]  ;;  %v2682_v12 = vld [vmem:[#allocation67_spill] sm:$0xff] }
 0x1f3   : > { %1257 = vst [vmem:[%s2268_s22 + $0x130] sm:$0xff] %v1199_v9  ;;  %1258 = vst.msk [vmem:[%s2268_s22 + $0x138] sm:$0xff] %vm261_vm0, %v1200_v33  ;;  %v1145_v52 = vadd.f32 %v2247_v25, %v942_v61  ;;  %v1146_v28 = vadd.f32 %v2247_v25, %v943_v2  ;;  %v838_v21 = vpop.permute.xlu1 %837  ;;  %v873_v48 = vpop.permute.xlu0 %872  ;;  %v2684_v61 = vld [vmem:[#allocation3_spill] sm:$0xff] }
 0x1f4   : > { %v1189_v43 = vmax.f32 %v1131_v37, 0.0  ;;  %v1190_v14 = vmax.f32 %v1132_v17, 0.0  ;;  %v932_v18 = vmul.f32 %v838_v21, %v2670_v26  ;;  %v933_v54 = vmul.f32 %v838_v21, %v2671_v20  ;;  %v2685_v17 = vld [vmem:[#allocation55_spill] sm:$0xff] }
 0x1f5   : > { %v1203_v47 = vmax.f32 %v1145_v52, 0.0  ;;  %v1204_v22 = vmax.f32 %v1146_v28, 0.0  ;;  %v946_v51 = vmul.f32 %v873_v48, %v2672_v57  ;;  %v947_v49 = vmul.f32 %v873_v48, %v2673_v38  ;;  %v2686_v28 = vld [vmem:[#allocation56_spill] sm:$0xff] }
 0x1f6   : > { %1247 = vst [vmem:[%s2268_s22 + $0xe0] sm:$0xff] %v1189_v43  ;;  %1248 = vst.msk [vmem:[%s2268_s22 + $0xe8] sm:$0xff] %vm261_vm0, %v1190_v14  ;;  %v1135_v25 = vadd.f32 %v2674_v31, %v932_v18  ;;  %v1136_v15 = vadd.f32 %v2674_v31, %v933_v54 }
 0x1f7   : > { %1261 = vst [vmem:[%s2268_s22 + $0x150] sm:$0xff] %v1203_v47  ;;  %1262 = vst.msk [vmem:[%s2268_s22 + $0x158] sm:$0xff] %vm261_vm0, %v1204_v22  ;;  %v1149_v0 = vadd.f32 %v2251_v11, %v946_v51  ;;  %v1150_v1 = vadd.f32 %v2251_v11, %v947_v49  ;;  %v848_v6 = vpop.permute.xlu1 %847  ;;  %v883_v29 = vpop.permute.xlu0 %882  ;;  %v2679_v11 = vld [vmem:[#allocation65_spill] sm:$0xff]  ;;  %v2687_v51 = vld [vmem:[#allocation59_spill] sm:$0xff] }
 0x1f8   : > { %v1193_v19 = vmax.f32 %v1135_v25, 0.0  ;;  %v1194_v55 = vmax.f32 %v1136_v15, 0.0  ;;  %v936_v13 = vmul.f32 %v848_v6, %v2675_v35  ;;  %v937_v30 = vmul.f32 %v848_v6, %v2676_v5  ;;  %v2688_v49 = vld [vmem:[#allocation2_spill] sm:$0xff]  ;;  %v2689_v6 = vld [vmem:[#allocation5_spill] sm:$0xff] }
 0x1f9   : > { %v1207_v34 = vmax.f32 %v1149_v0, 0.0  ;;  %v1208_v42 = vmax.f32 %v1150_v1, 0.0  ;;  %v950_v8 = vmul.f32 %v883_v29, %v2677_v3  ;;  %v951_v27 = vmul.f32 %v883_v29, %v2678_v32  ;;  %v2692_v3 = vld [vmem:[#allocation6_spill] sm:$0xff] }
 0x1fa   : > { %1251 = vst [vmem:[%s2268_s22 + $0x100] sm:$0xff] %v1193_v19  ;;  %1252 = vst.msk [vmem:[%s2268_s22 + $0x108] sm:$0xff] %vm261_vm0, %v1194_v55  ;;  %v1139_v45 = vadd.f32 %v2679_v11, %v936_v13  ;;  %v1140_v63 = vadd.f32 %v2679_v11, %v937_v30  ;;  %v2690_v19 = vld [vmem:[#allocation4_spill] sm:$0xff] }
 0x1fb   : > { %1265 = vst [vmem:[%s2268_s22 + $0x170] sm:$0xff] %v1207_v34  ;;  %1266 = vst.msk [vmem:[%s2268_s22 + $0x178] sm:$0xff] %vm261_vm0, %v1208_v42  ;;  %v1153_v40 = vadd.f32 %v2255_v10, %v950_v8  ;;  %v1154_v56 = vadd.f32 %v2255_v10, %v951_v27  ;;  %v858_v39 = vpop.permute.xlu1 %857  ;;  %v893_v59 = vpop.permute.xlu0 %892  ;;  %v2683_v10 = vld [vmem:[#allocation60_spill] sm:$0xff] }
 0x1fc   : > { %v1197_v7 = vmax.f32 %v1139_v45, 0.0  ;;  %v1198_v60 = vmax.f32 %v1140_v63, 0.0  ;;  %v940_v46 = vmul.f32 %v858_v39, %v2680_v58  ;;  %v941_v16 = vmul.f32 %v858_v39, %v2681_v50 }
 0x1fd   : > { %v1211_v41 = vmax.f32 %v1153_v40, 0.0  ;;  %v1212_v44 = vmax.f32 %v1154_v56, 0.0  ;;  %v954_v62 = vmul.f32 %v893_v59, %v2683_v10  ;;  %v955_v36 = vmul.f32 %v893_v59, %v2684_v61 }
 0x1fe   : > { %1255 = vst [vmem:[%s2268_s22 + $0x120] sm:$0xff] %v1197_v7  ;;  %1256 = vst.msk [vmem:[%s2268_s22 + $0x128] sm:$0xff] %vm261_vm0, %v1198_v60  ;;  %v1143_v9 = vadd.f32 %v2682_v12, %v940_v46  ;;  %v1144_v33 = vadd.f32 %v2682_v12, %v941_v16 }
 0x1ff   : > { %1269 = vst [vmem:[%s2268_s22 + $0x190] sm:$0xff] %v1211_v41  ;;  %1270 = vst.msk [vmem:[%s2268_s22 + $0x198] sm:$0xff] %vm261_vm0, %v1212_v44  ;;  %v868_v2 = vpop.permute.xlu1 %867 }
 0x200   : > { %v1201_v4 = vmax.f32 %v1143_v9, 0.0  ;;  %v1202_v37 = vmax.f32 %v1144_v33, 0.0  ;;  %v944_v52 = vmul.f32 %v868_v2, %v2685_v17  ;;  %v945_v21 = vmul.f32 %v868_v2, %v2686_v28  ;;  %v1096_v48 = vpop.permute.xlu0 %1095 }
 0x201   : > { %v1157_v43 = vadd.f32 %v1096_v48, %v954_v62  ;;  %v1158_v14 = vadd.f32 %v1096_v48, %v955_v36 }
 0x202   : > { %1259 = vst [vmem:[%s2268_s22 + $0x140] sm:$0xff] %v1201_v4  ;;  %1260 = vst.msk [vmem:[%s2268_s22 + $0x148] sm:$0xff] %vm261_vm0, %v1202_v37  ;;  %v1147_v26 = vadd.f32 %v2249_v24, %v944_v52  ;;  %v1148_v18 = vadd.f32 %v2249_v24, %v945_v21 }
 0x203   : > { %v1215_v20 = vmax.f32 %v1157_v43, 0.0  ;;  %v1216_v54 = vmax.f32 %v1158_v14, 0.0  ;;  %v878_v47 = vpop.permute.xlu1 %877 }
 0x204   : > { %v1205_v22 = vmax.f32 %v1147_v26, 0.0  ;;  %v1206_v57 = vmax.f32 %v1148_v18, 0.0  ;;  %v948_v38 = vmul.f32 %v878_v47, %v2687_v51  ;;  %v949_v31 = vmul.f32 %v878_v47, %v2688_v49 }
 0x205   : > { %1273 = vst [vmem:[%s2268_s22 + $0x1b0] sm:$0xff] %v1215_v20  ;;  %1274 = vst.msk [vmem:[%s2268_s22 + $0x1b8] sm:$0xff] %vm261_vm0, %v1216_v54 }
 0x206   : > { %1263 = vst [vmem:[%s2268_s22 + $0x160] sm:$0xff] %v1205_v22  ;;  %1264 = vst.msk [vmem:[%s2268_s22 + $0x168] sm:$0xff] %vm261_vm0, %v1206_v57  ;;  %v1151_v24 = vadd.f32 %v2253_v53, %v948_v38  ;;  %v1152_v25 = vadd.f32 %v2253_v53, %v949_v31  ;;  %v2691_v53 = vld [vmem:[#allocation7_spill] sm:$0xff] }
 0x207   : > { %v888_v15 = vpop.permute.xlu1 %887 }
 0x208   : > { %v1209_v0 = vmax.f32 %v1151_v24, 0.0  ;;  %v1210_v1 = vmax.f32 %v1152_v25, 0.0  ;;  %v952_v29 = vmul.f32 %v888_v15, %v2689_v6  ;;  %v953_v55 = vmul.f32 %v888_v15, %v2690_v19 }
 0x20a   : > { %1267 = vst [vmem:[%s2268_s22 + $0x180] sm:$0xff] %v1209_v0  ;;  %1268 = vst.msk [vmem:[%s2268_s22 + $0x188] sm:$0xff] %vm261_vm0, %v1210_v1  ;;  %v1155_v35 = vadd.f32 %v2257_v23, %v952_v29  ;;  %v1156_v13 = vadd.f32 %v2257_v23, %v953_v55 }
 0x20b   : > { %v898_v5 = vpop.permute.xlu1 %897 }
 0x20c   : > { %v1213_v30 = vmax.f32 %v1155_v35, 0.0  ;;  %v1214_v34 = vmax.f32 %v1156_v13, 0.0  ;;  %v956_v42 = vmul.f32 %v898_v5, %v2691_v53  ;;  %v957_v8 = vmul.f32 %v898_v5, %v2692_v3 }
 0x20e   : > { %1271 = vst [vmem:[%s2268_s22 + $0x1a0] sm:$0xff] %v1213_v30  ;;  %1272 = vst.msk [vmem:[%s2268_s22 + $0x1a8] sm:$0xff] %vm261_vm0, %v1214_v34 }
 0x210   : > { %v1101_v32 = vpop.permute.xlu1 %1100 }
 0x211   : > { %v1159_v27 = vadd.f32 %v1101_v32, %v956_v42  ;;  %v1160_v11 = vadd.f32 %v1101_v32, %v957_v8 }
 0x213   : > { %v1217_v45 = vmax.f32 %v1159_v27, 0.0  ;;  %v1218_v63 = vmax.f32 %v1160_v11, 0.0 }
 0x215   : > { %1275 = vst [vmem:[%s2268_s22 + $0x1c0] sm:$0xff] %v1217_v45  ;;  %1276 = vst.msk [vmem:[%s2268_s22 + $0x1c8] sm:$0xff] %vm261_vm0, %v1218_v63 }
 0x216 PF: > { %s12_s9 = sadd.s32 1, %s1441_s9  }
 0x217   : > { %p9_p4 = scmp.ge.s32.totalorder %s12_s9, 6  }
 0x219   :  { %11 = sbr.rel (!%p9_p4) target bundleno = 1 (0x1), region = 61 }

</bundles_post_ra>
